<compile_context>
chip_gen: v7x
topology: tpu7x:2x2x1
jax: 0.10.0
libtpu: 0.0.40
codegen_flags: <defaults>
</compile_context>

<pallas_src>
import math
import functools

import jax
import jax.numpy as jnp
from jax.experimental import pallas as pl
from jax.experimental.pallas import tpu as pltpu


# ---------------------------------------------------------------------------
# In-kernel helpers (traced inside the Pallas kernel body)
# ---------------------------------------------------------------------------
def _layernorm(x, gamma, beta, eps):
    mean = jnp.mean(x, axis=-1, keepdims=True)
    var = jnp.mean((x - mean) ** 2, axis=-1, keepdims=True)
    return (x - mean) * jax.lax.rsqrt(var + eps) * gamma + beta


def _gelu_tanh(x):
    c = math.sqrt(2.0 / math.pi)
    return 0.5 * x * (1.0 + jnp.tanh(c * (x + 0.044715 * x * x * x)))


# ---------------------------------------------------------------------------
# Pallas kernel: one grid step processes ONE batch element, (T, C) rows.
# ---------------------------------------------------------------------------
def encoder_layer_kernel(x_ref,
                         ln1_g_ref, ln1_b_ref,
                         qkv_w_ref, qkv_b_ref,
                         o_w_ref, o_b_ref,
                         ln2_g_ref, ln2_b_ref,
                         fc1_w_ref, fc1_b_ref,
                         fc2_w_ref, fc2_b_ref,
                         out_ref,
                         *, num_heads, eps):
    T, C = x_ref.shape
    H = num_heads
    hd = C // H

    x = x_ref[...].astype(jnp.float32)                       # (T, C)

    # ---- LayerNorm 1 (f32 stats) ----
    h = _layernorm(x, ln1_g_ref[...], ln1_b_ref[...], eps)
    h_bf = h.astype(jnp.bfloat16)                             # hoisted cast

    # ---- QKV projection with head-blocked weights (3H, C, hd).
    #      Each head tile comes straight out of its own 2-D matmul and is
    #      stacked along the leading (head) axis -> no masked lane-offset
    #      scatter into scratch, no XLU rotates.  The attention scale is
    #      already folded into the q slices of the weight/bias offline.
    def proj_heads(base):
        tiles = []
        for hh in range(H):
            g = base + hh
            tiles.append(jnp.dot(h_bf, qkv_w_ref[g],
                                 preferred_element_type=jnp.float32)
                         + qkv_b_ref[g])                      # (T, hd) f32
        return jnp.stack(tiles, axis=0).astype(jnp.bfloat16)  # (H, T, hd)

    q = proj_heads(0)
    k = proj_heads(H)
    v = proj_heads(2 * H)

    # ---- head-batched attention: one pair of batched contractions,
    #      softmax statistics in f32.
    s = jnp.einsum("htd,hsd->hts", q, k,
                   preferred_element_type=jnp.float32)        # (H, T, T)
    s = s - jnp.max(s, axis=-1, keepdims=True)
    p = jnp.exp(s)
    p = p * pl.reciprocal(jnp.sum(p, axis=-1, keepdims=True), approx=True)
    yh = jnp.einsum("hts,hsd->htd", p.astype(jnp.bfloat16), v,
                    preferred_element_type=jnp.float32)       # (H, T, hd)
    yh_bf = yh.astype(jnp.bfloat16)

    # ---- output projection with the head-concat folded in:
    #      y = sum_h yh[h] @ o_w[h]  (o_w stored head-blocked (H, hd, C));
    #      no re-assembled (T, C) staging buffer, no masked lane writes.
    y = jnp.zeros((T, C), jnp.float32)
    for hh in range(H):
        y = y + jnp.dot(yh_bf[hh], o_w_ref[hh],
                        preferred_element_type=jnp.float32)
    y = y + o_b_ref[...]

    h1 = x + y                                                # residual 1 (f32)

    # ---- LayerNorm 2 + MLP (GELU tanh).  Elementwise kept in f32 for
    #      portability to v5e (no bf16 VPU/EUP); on v6e/v7x this block could
    #      run in bf16 to halve VALU work.
    h2 = _layernorm(h1, ln2_g_ref[...], ln2_b_ref[...], eps)
    m = jnp.dot(h2.astype(jnp.bfloat16), fc1_w_ref[...],
                preferred_element_type=jnp.float32) + fc1_b_ref[...]
    m = _gelu_tanh(m)
    m = jnp.dot(m.astype(jnp.bfloat16), fc2_w_ref[...],
                preferred_element_type=jnp.float32) + fc2_b_ref[...]

    out_ref[...] = (h1 + m).astype(out_ref.dtype)             # residual 2


# ---------------------------------------------------------------------------
# Wrapper: head-block the weights offline, grid over batch elements.
# ---------------------------------------------------------------------------
def encoder_layer(x, params, *, num_heads, eps):
    B, T, C = x.shape
    H = num_heads
    hd = C // H
    scale = 1.0 / math.sqrt(hd)

    def heads_w(w):          # (C, C) -> (H, C, hd)
        return w.reshape(C, H, hd).transpose(1, 0, 2)

    def heads_b(b):          # (1, C) -> (H, 1, hd)
        return b.reshape(1, H, hd).transpose(1, 0, 2)

    # Head-blocked, fused QKV weights; attention scale folded into q (free).
    qkv_w = jnp.concatenate([heads_w(params["q_w"] * scale),
                             heads_w(params["k_w"]),
                             heads_w(params["v_w"])],
                            axis=0).astype(jnp.bfloat16)          # (3H, C, hd)
    qkv_b = jnp.concatenate([heads_b(params["q_b"] * scale),
                             heads_b(params["k_b"]),
                             heads_b(params["v_b"])],
                            axis=0).astype(jnp.float32)           # (3H, 1, hd)
    o_w = params["o_w"].reshape(H, hd, C).astype(jnp.bfloat16)    # (H, hd, C)
    fc1_w = params["fc1_w"].astype(jnp.bfloat16)
    fc2_w = params["fc2_w"].astype(jnp.bfloat16)

    # Activations stay f32 end-to-end (matches the PyTorch module dtype);
    # bf16 activation I/O would halve HBM traffic if desired.
    x2 = x.reshape(B * T, C)                                      # free in XLA

    def const_spec(arr):
        nd = arr.ndim
        idx = lambda i, _nd=nd: (0,) * _nd
        # Constant weights: index_map never changes, so double-buffering them
        # is pure VMEM waste at real ViT sizes -> single-buffer them.
        try:
            return pl.BlockSpec(arr.shape, idx, pipeline_mode=pl.Buffered(1))
        except Exception:   # older jax without pipeline_mode support
            return pl.BlockSpec(arr.shape, idx)

    in_specs = [
        pl.BlockSpec((T, C), lambda i: (i, 0)),                   # x rows
        const_spec(params["ln1_g"]), const_spec(params["ln1_b"]),
        const_spec(qkv_w), const_spec(qkv_b),
        const_spec(o_w), const_spec(params["o_b"]),
        const_spec(params["ln2_g"]), const_spec(params["ln2_b"]),
        const_spec(fc1_w), const_spec(params["fc1_b"]),
        const_spec(fc2_w), const_spec(params["fc2_b"]),
    ]

    kernel = functools.partial(encoder_layer_kernel, num_heads=H, eps=eps)

    out2 = pl.pallas_call(
        kernel,
        out_shape=jax.ShapeDtypeStruct((B * T, C), x.dtype),
        grid_spec=pltpu.PrefetchScalarGridSpec(
            num_scalar_prefetch=0,
            grid=(B,),                       # >= 2 steps: megacore + pipelining
            in_specs=in_specs,
            out_specs=pl.BlockSpec((T, C), lambda i: (i, 0))),
        compiler_params=pltpu.CompilerParams(
            dimension_semantics=("parallel",),
            # Explicit scoped-VMEM budget: v5e defaults to 16 MiB and v7x has
            # only 64 MiB physical; at real ViT sizes the default is too tight.
            vmem_limit_bytes=32 * 1024 * 1024),
    )(x2,
      params["ln1_g"], params["ln1_b"],
      qkv_w, qkv_b,
      o_w, params["o_b"],
      params["ln2_g"], params["ln2_b"],
      fc1_w, params["fc1_b"],
      fc2_w, params["fc2_b"])

    return out2.reshape(B, T, C)


# ---------------------------------------------------------------------------
# Pure-JAX f32 reference for correctness check
# ---------------------------------------------------------------------------
def encoder_layer_ref(x, p, *, num_heads, eps):
    B, T, C = x.shape
    hd = C // num_heads

    def ln(v, g, b):
        mu = jnp.mean(v, -1, keepdims=True)
        var = jnp.mean((v - mu) ** 2, -1, keepdims=True)
        return (v - mu) / jnp.sqrt(var + eps) * g + b

    h = ln(x, p["ln1_g"][0], p["ln1_b"][0])
    q = h @ p["q_w"] + p["q_b"][0]
    k = h @ p["k_w"] + p["k_b"][0]
    v = h @ p["v_w"] + p["v_b"][0]
    q = q.reshape(B, T, num_heads, hd).transpose(0, 2, 1, 3)
    k = k.reshape(B, T, num_heads, hd).transpose(0, 2, 1, 3)
    v = v.reshape(B, T, num_heads, hd).transpose(0, 2, 1, 3)
    s = jnp.einsum("bhqd,bhkd->bhqk", q, k) / math.sqrt(hd)
    a = jax.nn.softmax(s, axis=-1)
    y = jnp.einsum("bhqk,bhkd->bhqd", a, v).transpose(0, 2, 1, 3).reshape(B, T, C)
    y = y @ p["o_w"] + p["o_b"][0]
    h1 = x + y
    h2 = ln(h1, p["ln2_g"][0], p["ln2_b"][0])
    m = h2 @ p["fc1_w"] + p["fc1_b"][0]
    c = math.sqrt(2.0 / math.pi)
    m = 0.5 * m * (1.0 + jnp.tanh(c * (m + 0.044715 * m ** 3)))
    m = m @ p["fc2_w"] + p["fc2_b"][0]
    return h1 + m


# ---------------------------------------------------------------------------
if __name__ == "__main__":
    # EncoderConfig-consistent small shapes:
    #   image_size=16, patch_size=4 -> T = (16/4)^2 = 16 tokens
    #   hidden_size=32, num_attention_heads=4, intermediate_size=64
    B, T, C, H, I = 2, 16, 32, 4, 64
    eps = 1e-6

    key = jax.random.PRNGKey(0)
    ks = jax.random.split(key, 13)

    def w(k, shape, s=0.02):
        return (s * jax.random.normal(k, shape)).astype(jnp.float32)

    params = {
        "ln1_g": jnp.ones((1, C), jnp.float32),
        "ln1_b": jnp.zeros((1, C), jnp.float32),
        "q_w": w(ks[0], (C, C)), "q_b": w(ks[1], (1, C)),
        "k_w": w(ks[2], (C, C)), "k_b": w(ks[3], (1, C)),
        "v_w": w(ks[4], (C, C)), "v_b": w(ks[5], (1, C)),
        "o_w": w(ks[6], (C, C)), "o_b": w(ks[7], (1, C)),
        "ln2_g": jnp.ones((1, C), jnp.float32),
        "ln2_b": jnp.zeros((1, C), jnp.float32),
        "fc1_w": w(ks[8], (C, I)), "fc1_b": w(ks[9], (1, I)),
        "fc2_w": w(ks[10], (I, C)), "fc2_b": w(ks[11], (1, C)),
    }

    x = jax.random.normal(ks[12], (B, T, C), jnp.float32)

    out = encoder_layer(x, params, num_heads=H, eps=eps)
    out = jax.block_until_ready(out)

    ref = encoder_layer_ref(x, params, num_heads=H, eps=eps)
    assert out.shape == (B, T, C)
    # bf16 MXU operands (f32 accumulation) + approx reciprocal => loose tol.
    max_diff = float(jnp.max(jnp.abs(out - ref)))
    assert jnp.allclose(out, ref, atol=2e-2, rtol=2e-2), \
        f"mismatch vs JAX reference, max abs diff = {max_diff}"

    print("KERNEL_OK")
</pallas_src>

<mosaic_0001>
module attributes {stable_mosaic.version = 11 : i64} {
  func.func @encoder_layer_kernel(%arg0: i32, %arg1: memref<16x32xf32, #tpu.memory_space<vmem>>, %arg2: memref<1x32xf32, #tpu.memory_space<vmem>>, %arg3: memref<1x32xf32, #tpu.memory_space<vmem>>, %arg4: memref<12x32x8xbf16, #tpu.memory_space<vmem>>, %arg5: memref<12x1x8xf32, #tpu.memory_space<vmem>>, %arg6: memref<4x8x32xbf16, #tpu.memory_space<vmem>>, %arg7: memref<1x32xf32, #tpu.memory_space<vmem>>, %arg8: memref<1x32xf32, #tpu.memory_space<vmem>>, %arg9: memref<1x32xf32, #tpu.memory_space<vmem>>, %arg10: memref<32x64xbf16, #tpu.memory_space<vmem>>, %arg11: memref<1x64xf32, #tpu.memory_space<vmem>>, %arg12: memref<64x32xbf16, #tpu.memory_space<vmem>>, %arg13: memref<1x32xf32, #tpu.memory_space<vmem>>, %arg14: memref<16x32xf32, #tpu.memory_space<vmem>>) attributes {dimension_semantics = [#tpu.dimension_semantics<parallel>], iteration_bounds = array<i64: 2>, scalar_prefetch = 0 : i64, scratch_operands = 0 : i64, tpu.core_type = #tpu.core_type<tc>, window_params = [{transform_indices = @transform_0, window_bounds = array<i64: 16, 32>}, {pipeline_mode = #tpu.pipeline_mode<synchronous>, transform_indices = @transform_1, window_bounds = array<i64: 1, 32>}, {pipeline_mode = #tpu.pipeline_mode<synchronous>, transform_indices = @transform_2, window_bounds = array<i64: 1, 32>}, {pipeline_mode = #tpu.pipeline_mode<synchronous>, transform_indices = @transform_3, window_bounds = array<i64: 12, 32, 8>}, {pipeline_mode = #tpu.pipeline_mode<synchronous>, transform_indices = @transform_4, window_bounds = array<i64: 12, 1, 8>}, {pipeline_mode = #tpu.pipeline_mode<synchronous>, transform_indices = @transform_5, window_bounds = array<i64: 4, 8, 32>}, {pipeline_mode = #tpu.pipeline_mode<synchronous>, transform_indices = @transform_6, window_bounds = array<i64: 1, 32>}, {pipeline_mode = #tpu.pipeline_mode<synchronous>, transform_indices = @transform_7, window_bounds = array<i64: 1, 32>}, {pipeline_mode = #tpu.pipeline_mode<synchronous>, transform_indices = @transform_8, window_bounds = array<i64: 1, 32>}, {pipeline_mode = #tpu.pipeline_mode<synchronous>, transform_indices = @transform_9, window_bounds = array<i64: 32, 64>}, {pipeline_mode = #tpu.pipeline_mode<synchronous>, transform_indices = @transform_10, window_bounds = array<i64: 1, 64>}, {pipeline_mode = #tpu.pipeline_mode<synchronous>, transform_indices = @transform_11, window_bounds = array<i64: 64, 32>}, {pipeline_mode = #tpu.pipeline_mode<synchronous>, transform_indices = @transform_12, window_bounds = array<i64: 1, 32>}, {transform_indices = @transform_13, window_bounds = array<i64: 16, 32>}]} {
    %c0 = arith.constant 0 : index
    %c0_0 = arith.constant 0 : index
    %0 = vector.load %arg1[%c0, %c0_0] : memref<16x32xf32, #tpu.memory_space<vmem>>, vector<16x32xf32>
    %c0_1 = arith.constant 0 : index
    %c0_2 = arith.constant 0 : index
    %1 = vector.load %arg2[%c0_1, %c0_2] : memref<1x32xf32, #tpu.memory_space<vmem>>, vector<1x32xf32>
    %c0_3 = arith.constant 0 : index
    %c0_4 = arith.constant 0 : index
    %2 = vector.load %arg3[%c0_3, %c0_4] : memref<1x32xf32, #tpu.memory_space<vmem>>, vector<1x32xf32>
    %cst = arith.constant dense<0.000000e+00> : vector<16xf32>
    %3 = vector.multi_reduction <add>, %0, %cst [1] : vector<16x32xf32> to vector<16xf32>
    %4 = vector.shape_cast %3 : vector<16xf32> to vector<16x1xf32>
    %cst_5 = arith.constant 3.200000e+01 : f32
    %5 = vector.broadcast %cst_5 : f32 to vector<16x1xf32>
    %6 = arith.divf %4, %5 : vector<16x1xf32>
    %7 = vector.broadcast %6 : vector<16x1xf32> to vector<16x32xf32>
    %8 = arith.subf %0, %7 : vector<16x32xf32>
    %9 = arith.mulf %8, %8 : vector<16x32xf32>
    %cst_6 = arith.constant dense<0.000000e+00> : vector<16xf32>
    %10 = vector.multi_reduction <add>, %9, %cst_6 [1] : vector<16x32xf32> to vector<16xf32>
    %11 = vector.shape_cast %10 : vector<16xf32> to vector<16x1xf32>
    %cst_7 = arith.constant 3.200000e+01 : f32
    %12 = vector.broadcast %cst_7 : f32 to vector<16x1xf32>
    %13 = arith.divf %11, %12 : vector<16x1xf32>
    %14 = vector.broadcast %6 : vector<16x1xf32> to vector<16x32xf32>
    %15 = arith.subf %0, %14 : vector<16x32xf32>
    %cst_8 = arith.constant 9.99999997E-7 : f32
    %16 = vector.broadcast %cst_8 : f32 to vector<16x1xf32>
    %17 = arith.addf %13, %16 : vector<16x1xf32>
    %18 = math.rsqrt %17 : vector<16x1xf32>
    %19 = vector.broadcast %18 : vector<16x1xf32> to vector<16x32xf32>
    %20 = arith.mulf %15, %19 : vector<16x32xf32>
    %21 = vector.broadcast %1 : vector<1x32xf32> to vector<16x32xf32>
    %22 = arith.mulf %20, %21 : vector<16x32xf32>
    %23 = vector.broadcast %2 : vector<1x32xf32> to vector<16x32xf32>
    %24 = arith.addf %22, %23 : vector<16x32xf32>
    %25 = arith.truncf %24 : vector<16x32xf32> to vector<16x32xbf16>
    %c0_9 = arith.constant 0 : index
    %c0_10 = arith.constant 0 : index
    %c0_11 = arith.constant 0 : index
    %26 = vector.load %arg4[%c0_9, %c0_10, %c0_11] : memref<12x32x8xbf16, #tpu.memory_space<vmem>>, vector<1x32x8xbf16>
    %27 = vector.shape_cast %26 : vector<1x32x8xbf16> to vector<32x8xbf16>
    %cst_12 = arith.constant dense<0.000000e+00> : vector<16x8xf32>
    %28 = tpu.matmul %25, %27, %cst_12 {dimension_numbers = #tpu.dot_dimension_numbers<[1], [0], [0], [1], [0, 0, 1, 1], [], []>} : vector<16x32xbf16>, vector<32x8xbf16>, vector<16x8xf32> -> vector<16x8xf32>
    %c0_13 = arith.constant 0 : index
    %c0_14 = arith.constant 0 : index
    %c0_15 = arith.constant 0 : index
    %29 = vector.load %arg5[%c0_13, %c0_14, %c0_15] : memref<12x1x8xf32, #tpu.memory_space<vmem>>, vector<1x1x8xf32>
    %30 = vector.shape_cast %29 : vector<1x1x8xf32> to vector<1x8xf32>
    %31 = vector.broadcast %30 : vector<1x8xf32> to vector<16x8xf32>
    %32 = arith.addf %28, %31 : vector<16x8xf32>
    %c1 = arith.constant 1 : index
    %c0_16 = arith.constant 0 : index
    %c0_17 = arith.constant 0 : index
    %33 = vector.load %arg4[%c1, %c0_16, %c0_17] : memref<12x32x8xbf16, #tpu.memory_space<vmem>>, vector<1x32x8xbf16>
    %34 = vector.shape_cast %33 : vector<1x32x8xbf16> to vector<32x8xbf16>
    %cst_18 = arith.constant dense<0.000000e+00> : vector<16x8xf32>
    %35 = tpu.matmul %25, %34, %cst_18 {dimension_numbers = #tpu.dot_dimension_numbers<[1], [0], [0], [1], [0, 0, 1, 1], [], []>} : vector<16x32xbf16>, vector<32x8xbf16>, vector<16x8xf32> -> vector<16x8xf32>
    %c1_19 = arith.constant 1 : index
    %c0_20 = arith.constant 0 : index
    %c0_21 = arith.constant 0 : index
    %36 = vector.load %arg5[%c1_19, %c0_20, %c0_21] : memref<12x1x8xf32, #tpu.memory_space<vmem>>, vector<1x1x8xf32>
    %37 = vector.shape_cast %36 : vector<1x1x8xf32> to vector<1x8xf32>
    %38 = vector.broadcast %37 : vector<1x8xf32> to vector<16x8xf32>
    %39 = arith.addf %35, %38 : vector<16x8xf32>
    %c2 = arith.constant 2 : index
    %c0_22 = arith.constant 0 : index
    %c0_23 = arith.constant 0 : index
    %40 = vector.load %arg4[%c2, %c0_22, %c0_23] : memref<12x32x8xbf16, #tpu.memory_space<vmem>>, vector<1x32x8xbf16>
    %41 = vector.shape_cast %40 : vector<1x32x8xbf16> to vector<32x8xbf16>
    %cst_24 = arith.constant dense<0.000000e+00> : vector<16x8xf32>
    %42 = tpu.matmul %25, %41, %cst_24 {dimension_numbers = #tpu.dot_dimension_numbers<[1], [0], [0], [1], [0, 0, 1, 1], [], []>} : vector<16x32xbf16>, vector<32x8xbf16>, vector<16x8xf32> -> vector<16x8xf32>
    %c2_25 = arith.constant 2 : index
    %c0_26 = arith.constant 0 : index
    %c0_27 = arith.constant 0 : index
    %43 = vector.load %arg5[%c2_25, %c0_26, %c0_27] : memref<12x1x8xf32, #tpu.memory_space<vmem>>, vector<1x1x8xf32>
    %44 = vector.shape_cast %43 : vector<1x1x8xf32> to vector<1x8xf32>
    %45 = vector.broadcast %44 : vector<1x8xf32> to vector<16x8xf32>
    %46 = arith.addf %42, %45 : vector<16x8xf32>
    %c3 = arith.constant 3 : index
    %c0_28 = arith.constant 0 : index
    %c0_29 = arith.constant 0 : index
    %47 = vector.load %arg4[%c3, %c0_28, %c0_29] : memref<12x32x8xbf16, #tpu.memory_space<vmem>>, vector<1x32x8xbf16>
    %48 = vector.shape_cast %47 : vector<1x32x8xbf16> to vector<32x8xbf16>
    %cst_30 = arith.constant dense<0.000000e+00> : vector<16x8xf32>
    %49 = tpu.matmul %25, %48, %cst_30 {dimension_numbers = #tpu.dot_dimension_numbers<[1], [0], [0], [1], [0, 0, 1, 1], [], []>} : vector<16x32xbf16>, vector<32x8xbf16>, vector<16x8xf32> -> vector<16x8xf32>
    %c3_31 = arith.constant 3 : index
    %c0_32 = arith.constant 0 : index
    %c0_33 = arith.constant 0 : index
    %50 = vector.load %arg5[%c3_31, %c0_32, %c0_33] : memref<12x1x8xf32, #tpu.memory_space<vmem>>, vector<1x1x8xf32>
    %51 = vector.shape_cast %50 : vector<1x1x8xf32> to vector<1x8xf32>
    %52 = vector.broadcast %51 : vector<1x8xf32> to vector<16x8xf32>
    %53 = arith.addf %49, %52 : vector<16x8xf32>
    %54 = vector.shape_cast %32 : vector<16x8xf32> to vector<1x16x8xf32>
    %55 = vector.shape_cast %39 : vector<16x8xf32> to vector<1x16x8xf32>
    %56 = vector.shape_cast %46 : vector<16x8xf32> to vector<1x16x8xf32>
    %57 = vector.shape_cast %53 : vector<16x8xf32> to vector<1x16x8xf32>
    %58 = tpu.concatenate %54, %55, %56, %57 in 0 : vector<1x16x8xf32>, vector<1x16x8xf32>, vector<1x16x8xf32>, vector<1x16x8xf32> -> vector<4x16x8xf32>
    %59 = arith.truncf %58 : vector<4x16x8xf32> to vector<4x16x8xbf16>
    %c4 = arith.constant 4 : index
    %c0_34 = arith.constant 0 : index
    %c0_35 = arith.constant 0 : index
    %60 = vector.load %arg4[%c4, %c0_34, %c0_35] : memref<12x32x8xbf16, #tpu.memory_space<vmem>>, vector<1x32x8xbf16>
    %61 = vector.shape_cast %60 : vector<1x32x8xbf16> to vector<32x8xbf16>
    %cst_36 = arith.constant dense<0.000000e+00> : vector<16x8xf32>
    %62 = tpu.matmul %25, %61, %cst_36 {dimension_numbers = #tpu.dot_dimension_numbers<[1], [0], [0], [1], [0, 0, 1, 1], [], []>} : vector<16x32xbf16>, vector<32x8xbf16>, vector<16x8xf32> -> vector<16x8xf32>
    %c4_37 = arith.constant 4 : index
    %c0_38 = arith.constant 0 : index
    %c0_39 = arith.constant 0 : index
    %63 = vector.load %arg5[%c4_37, %c0_38, %c0_39] : memref<12x1x8xf32, #tpu.memory_space<vmem>>, vector<1x1x8xf32>
    %64 = vector.shape_cast %63 : vector<1x1x8xf32> to vector<1x8xf32>
    %65 = vector.broadcast %64 : vector<1x8xf32> to vector<16x8xf32>
    %66 = arith.addf %62, %65 : vector<16x8xf32>
    %c5 = arith.constant 5 : index
    %c0_40 = arith.constant 0 : index
    %c0_41 = arith.constant 0 : index
    %67 = vector.load %arg4[%c5, %c0_40, %c0_41] : memref<12x32x8xbf16, #tpu.memory_space<vmem>>, vector<1x32x8xbf16>
    %68 = vector.shape_cast %67 : vector<1x32x8xbf16> to vector<32x8xbf16>
    %cst_42 = arith.constant dense<0.000000e+00> : vector<16x8xf32>
    %69 = tpu.matmul %25, %68, %cst_42 {dimension_numbers = #tpu.dot_dimension_numbers<[1], [0], [0], [1], [0, 0, 1, 1], [], []>} : vector<16x32xbf16>, vector<32x8xbf16>, vector<16x8xf32> -> vector<16x8xf32>
    %c5_43 = arith.constant 5 : index
    %c0_44 = arith.constant 0 : index
    %c0_45 = arith.constant 0 : index
    %70 = vector.load %arg5[%c5_43, %c0_44, %c0_45] : memref<12x1x8xf32, #tpu.memory_space<vmem>>, vector<1x1x8xf32>
    %71 = vector.shape_cast %70 : vector<1x1x8xf32> to vector<1x8xf32>
    %72 = vector.broadcast %71 : vector<1x8xf32> to vector<16x8xf32>
    %73 = arith.addf %69, %72 : vector<16x8xf32>
    %c6 = arith.constant 6 : index
    %c0_46 = arith.constant 0 : index
    %c0_47 = arith.constant 0 : index
    %74 = vector.load %arg4[%c6, %c0_46, %c0_47] : memref<12x32x8xbf16, #tpu.memory_space<vmem>>, vector<1x32x8xbf16>
    %75 = vector.shape_cast %74 : vector<1x32x8xbf16> to vector<32x8xbf16>
    %cst_48 = arith.constant dense<0.000000e+00> : vector<16x8xf32>
    %76 = tpu.matmul %25, %75, %cst_48 {dimension_numbers = #tpu.dot_dimension_numbers<[1], [0], [0], [1], [0, 0, 1, 1], [], []>} : vector<16x32xbf16>, vector<32x8xbf16>, vector<16x8xf32> -> vector<16x8xf32>
    %c6_49 = arith.constant 6 : index
    %c0_50 = arith.constant 0 : index
    %c0_51 = arith.constant 0 : index
    %77 = vector.load %arg5[%c6_49, %c0_50, %c0_51] : memref<12x1x8xf32, #tpu.memory_space<vmem>>, vector<1x1x8xf32>
    %78 = vector.shape_cast %77 : vector<1x1x8xf32> to vector<1x8xf32>
    %79 = vector.broadcast %78 : vector<1x8xf32> to vector<16x8xf32>
    %80 = arith.addf %76, %79 : vector<16x8xf32>
    %c7 = arith.constant 7 : index
    %c0_52 = arith.constant 0 : index
    %c0_53 = arith.constant 0 : index
    %81 = vector.load %arg4[%c7, %c0_52, %c0_53] : memref<12x32x8xbf16, #tpu.memory_space<vmem>>, vector<1x32x8xbf16>
    %82 = vector.shape_cast %81 : vector<1x32x8xbf16> to vector<32x8xbf16>
    %cst_54 = arith.constant dense<0.000000e+00> : vector<16x8xf32>
    %83 = tpu.matmul %25, %82, %cst_54 {dimension_numbers = #tpu.dot_dimension_numbers<[1], [0], [0], [1], [0, 0, 1, 1], [], []>} : vector<16x32xbf16>, vector<32x8xbf16>, vector<16x8xf32> -> vector<16x8xf32>
    %c7_55 = arith.constant 7 : index
    %c0_56 = arith.constant 0 : index
    %c0_57 = arith.constant 0 : index
    %84 = vector.load %arg5[%c7_55, %c0_56, %c0_57] : memref<12x1x8xf32, #tpu.memory_space<vmem>>, vector<1x1x8xf32>
    %85 = vector.shape_cast %84 : vector<1x1x8xf32> to vector<1x8xf32>
    %86 = vector.broadcast %85 : vector<1x8xf32> to vector<16x8xf32>
    %87 = arith.addf %83, %86 : vector<16x8xf32>
    %88 = vector.shape_cast %66 : vector<16x8xf32> to vector<1x16x8xf32>
    %89 = vector.shape_cast %73 : vector<16x8xf32> to vector<1x16x8xf32>
    %90 = vector.shape_cast %80 : vector<16x8xf32> to vector<1x16x8xf32>
    %91 = vector.shape_cast %87 : vector<16x8xf32> to vector<1x16x8xf32>
    %92 = tpu.concatenate %88, %89, %90, %91 in 0 : vector<1x16x8xf32>, vector<1x16x8xf32>, vector<1x16x8xf32>, vector<1x16x8xf32> -> vector<4x16x8xf32>
    %93 = arith.truncf %92 : vector<4x16x8xf32> to vector<4x16x8xbf16>
    %c8 = arith.constant 8 : index
    %c0_58 = arith.constant 0 : index
    %c0_59 = arith.constant 0 : index
    %94 = vector.load %arg4[%c8, %c0_58, %c0_59] : memref<12x32x8xbf16, #tpu.memory_space<vmem>>, vector<1x32x8xbf16>
    %95 = vector.shape_cast %94 : vector<1x32x8xbf16> to vector<32x8xbf16>
    %cst_60 = arith.constant dense<0.000000e+00> : vector<16x8xf32>
    %96 = tpu.matmul %25, %95, %cst_60 {dimension_numbers = #tpu.dot_dimension_numbers<[1], [0], [0], [1], [0, 0, 1, 1], [], []>} : vector<16x32xbf16>, vector<32x8xbf16>, vector<16x8xf32> -> vector<16x8xf32>
    %c8_61 = arith.constant 8 : index
    %c0_62 = arith.constant 0 : index
    %c0_63 = arith.constant 0 : index
    %97 = vector.load %arg5[%c8_61, %c0_62, %c0_63] : memref<12x1x8xf32, #tpu.memory_space<vmem>>, vector<1x1x8xf32>
    %98 = vector.shape_cast %97 : vector<1x1x8xf32> to vector<1x8xf32>
    %99 = vector.broadcast %98 : vector<1x8xf32> to vector<16x8xf32>
    %100 = arith.addf %96, %99 : vector<16x8xf32>
    %c9 = arith.constant 9 : index
    %c0_64 = arith.constant 0 : index
    %c0_65 = arith.constant 0 : index
    %101 = vector.load %arg4[%c9, %c0_64, %c0_65] : memref<12x32x8xbf16, #tpu.memory_space<vmem>>, vector<1x32x8xbf16>
    %102 = vector.shape_cast %101 : vector<1x32x8xbf16> to vector<32x8xbf16>
    %cst_66 = arith.constant dense<0.000000e+00> : vector<16x8xf32>
    %103 = tpu.matmul %25, %102, %cst_66 {dimension_numbers = #tpu.dot_dimension_numbers<[1], [0], [0], [1], [0, 0, 1, 1], [], []>} : vector<16x32xbf16>, vector<32x8xbf16>, vector<16x8xf32> -> vector<16x8xf32>
    %c9_67 = arith.constant 9 : index
    %c0_68 = arith.constant 0 : index
    %c0_69 = arith.constant 0 : index
    %104 = vector.load %arg5[%c9_67, %c0_68, %c0_69] : memref<12x1x8xf32, #tpu.memory_space<vmem>>, vector<1x1x8xf32>
    %105 = vector.shape_cast %104 : vector<1x1x8xf32> to vector<1x8xf32>
    %106 = vector.broadcast %105 : vector<1x8xf32> to vector<16x8xf32>
    %107 = arith.addf %103, %106 : vector<16x8xf32>
    %c10 = arith.constant 10 : index
    %c0_70 = arith.constant 0 : index
    %c0_71 = arith.constant 0 : index
    %108 = vector.load %arg4[%c10, %c0_70, %c0_71] : memref<12x32x8xbf16, #tpu.memory_space<vmem>>, vector<1x32x8xbf16>
    %109 = vector.shape_cast %108 : vector<1x32x8xbf16> to vector<32x8xbf16>
    %cst_72 = arith.constant dense<0.000000e+00> : vector<16x8xf32>
    %110 = tpu.matmul %25, %109, %cst_72 {dimension_numbers = #tpu.dot_dimension_numbers<[1], [0], [0], [1], [0, 0, 1, 1], [], []>} : vector<16x32xbf16>, vector<32x8xbf16>, vector<16x8xf32> -> vector<16x8xf32>
    %c10_73 = arith.constant 10 : index
    %c0_74 = arith.constant 0 : index
    %c0_75 = arith.constant 0 : index
    %111 = vector.load %arg5[%c10_73, %c0_74, %c0_75] : memref<12x1x8xf32, #tpu.memory_space<vmem>>, vector<1x1x8xf32>
    %112 = vector.shape_cast %111 : vector<1x1x8xf32> to vector<1x8xf32>
    %113 = vector.broadcast %112 : vector<1x8xf32> to vector<16x8xf32>
    %114 = arith.addf %110, %113 : vector<16x8xf32>
    %c11 = arith.constant 11 : index
    %c0_76 = arith.constant 0 : index
    %c0_77 = arith.constant 0 : index
    %115 = vector.load %arg4[%c11, %c0_76, %c0_77] : memref<12x32x8xbf16, #tpu.memory_space<vmem>>, vector<1x32x8xbf16>
    %116 = vector.shape_cast %115 : vector<1x32x8xbf16> to vector<32x8xbf16>
    %cst_78 = arith.constant dense<0.000000e+00> : vector<16x8xf32>
    %117 = tpu.matmul %25, %116, %cst_78 {dimension_numbers = #tpu.dot_dimension_numbers<[1], [0], [0], [1], [0, 0, 1, 1], [], []>} : vector<16x32xbf16>, vector<32x8xbf16>, vector<16x8xf32> -> vector<16x8xf32>
    %c11_79 = arith.constant 11 : index
    %c0_80 = arith.constant 0 : index
    %c0_81 = arith.constant 0 : index
    %118 = vector.load %arg5[%c11_79, %c0_80, %c0_81] : memref<12x1x8xf32, #tpu.memory_space<vmem>>, vector<1x1x8xf32>
    %119 = vector.shape_cast %118 : vector<1x1x8xf32> to vector<1x8xf32>
    %120 = vector.broadcast %119 : vector<1x8xf32> to vector<16x8xf32>
    %121 = arith.addf %117, %120 : vector<16x8xf32>
    %122 = vector.shape_cast %100 : vector<16x8xf32> to vector<1x16x8xf32>
    %123 = vector.shape_cast %107 : vector<16x8xf32> to vector<1x16x8xf32>
    %124 = vector.shape_cast %114 : vector<16x8xf32> to vector<1x16x8xf32>
    %125 = vector.shape_cast %121 : vector<16x8xf32> to vector<1x16x8xf32>
    %126 = tpu.concatenate %122, %123, %124, %125 in 0 : vector<1x16x8xf32>, vector<1x16x8xf32>, vector<1x16x8xf32>, vector<1x16x8xf32> -> vector<4x16x8xf32>
    %127 = arith.truncf %126 : vector<4x16x8xf32> to vector<4x16x8xbf16>
    "tpu.trace_start"() <{level = 10 : i32, message = "htd,hsd->hts"}> : () -> ()
    %cst_82 = arith.constant dense<0.000000e+00> : vector<4x16x16xf32>
    %128 = tpu.matmul %59, %93, %cst_82 {dimension_numbers = #tpu.dot_dimension_numbers<[2], [2], [1], [1], [0, 0, 0, 1, 1, 1], [0], [0]>} : vector<4x16x8xbf16>, vector<4x16x8xbf16>, vector<4x16x16xf32> -> vector<4x16x16xf32>
    "tpu.trace_stop"() : () -> ()
    %cst_83 = arith.constant dense<0xFF800000> : vector<4x16xf32>
    %129 = vector.multi_reduction <maximumf>, %128, %cst_83 [2] : vector<4x16x16xf32> to vector<4x16xf32>
    %130 = vector.shape_cast %129 : vector<4x16xf32> to vector<4x16x1xf32>
    %131 = vector.broadcast %130 : vector<4x16x1xf32> to vector<4x16x16xf32>
    %132 = arith.subf %128, %131 : vector<4x16x16xf32>
    %133 = math.exp %132 : vector<4x16x16xf32>
    %cst_84 = arith.constant dense<0.000000e+00> : vector<4x16xf32>
    %134 = vector.multi_reduction <add>, %133, %cst_84 [2] : vector<4x16x16xf32> to vector<4x16xf32>
    %135 = vector.shape_cast %134 : vector<4x16xf32> to vector<4x16x1xf32>
    %136 = tpu.reciprocal %135 {approx = true} : vector<4x16x1xf32> -> vector<4x16x1xf32>
    %137 = vector.broadcast %136 : vector<4x16x1xf32> to vector<4x16x16xf32>
    %138 = arith.mulf %133, %137 : vector<4x16x16xf32>
    %139 = arith.truncf %138 : vector<4x16x16xf32> to vector<4x16x16xbf16>
    "tpu.trace_start"() <{level = 10 : i32, message = "hts,hsd->htd"}> : () -> ()
    %cst_85 = arith.constant dense<0.000000e+00> : vector<4x16x8xf32>
    %140 = tpu.matmul %139, %127, %cst_85 {dimension_numbers = #tpu.dot_dimension_numbers<[2], [1], [1], [2], [0, 0, 0, 1, 1, 2], [0], [0]>} : vector<4x16x16xbf16>, vector<4x16x8xbf16>, vector<4x16x8xf32> -> vector<4x16x8xf32>
    "tpu.trace_stop"() : () -> ()
    %141 = arith.truncf %140 : vector<4x16x8xf32> to vector<4x16x8xbf16>
    %cst_86 = arith.constant 0.000000e+00 : f32
    %142 = vector.broadcast %cst_86 : f32 to vector<16x32xf32>
    %143 = vector.extract_strided_slice %141 {offsets = [0, 0, 0], sizes = [1, 16, 8], strides = [1, 1, 1]} : vector<4x16x8xbf16> to vector<1x16x8xbf16>
    %144 = vector.shape_cast %143 : vector<1x16x8xbf16> to vector<16x8xbf16>
    %c0_87 = arith.constant 0 : index
    %c0_88 = arith.constant 0 : index
    %c0_89 = arith.constant 0 : index
    %145 = vector.load %arg6[%c0_87, %c0_88, %c0_89] : memref<4x8x32xbf16, #tpu.memory_space<vmem>>, vector<1x8x32xbf16>
    %146 = vector.shape_cast %145 : vector<1x8x32xbf16> to vector<8x32xbf16>
    %cst_90 = arith.constant dense<0.000000e+00> : vector<16x32xf32>
    %147 = tpu.matmul %144, %146, %cst_90 {dimension_numbers = #tpu.dot_dimension_numbers<[1], [0], [0], [1], [0, 0, 1, 1], [], []>} : vector<16x8xbf16>, vector<8x32xbf16>, vector<16x32xf32> -> vector<16x32xf32>
    %148 = arith.addf %142, %147 : vector<16x32xf32>
    %149 = vector.extract_strided_slice %141 {offsets = [1, 0, 0], sizes = [1, 16, 8], strides = [1, 1, 1]} : vector<4x16x8xbf16> to vector<1x16x8xbf16>
    %150 = vector.shape_cast %149 : vector<1x16x8xbf16> to vector<16x8xbf16>
    %c1_91 = arith.constant 1 : index
    %c0_92 = arith.constant 0 : index
    %c0_93 = arith.constant 0 : index
    %151 = vector.load %arg6[%c1_91, %c0_92, %c0_93] : memref<4x8x32xbf16, #tpu.memory_space<vmem>>, vector<1x8x32xbf16>
    %152 = vector.shape_cast %151 : vector<1x8x32xbf16> to vector<8x32xbf16>
    %cst_94 = arith.constant dense<0.000000e+00> : vector<16x32xf32>
    %153 = tpu.matmul %150, %152, %cst_94 {dimension_numbers = #tpu.dot_dimension_numbers<[1], [0], [0], [1], [0, 0, 1, 1], [], []>} : vector<16x8xbf16>, vector<8x32xbf16>, vector<16x32xf32> -> vector<16x32xf32>
    %154 = arith.addf %148, %153 : vector<16x32xf32>
    %155 = vector.extract_strided_slice %141 {offsets = [2, 0, 0], sizes = [1, 16, 8], strides = [1, 1, 1]} : vector<4x16x8xbf16> to vector<1x16x8xbf16>
    %156 = vector.shape_cast %155 : vector<1x16x8xbf16> to vector<16x8xbf16>
    %c2_95 = arith.constant 2 : index
    %c0_96 = arith.constant 0 : index
    %c0_97 = arith.constant 0 : index
    %157 = vector.load %arg6[%c2_95, %c0_96, %c0_97] : memref<4x8x32xbf16, #tpu.memory_space<vmem>>, vector<1x8x32xbf16>
    %158 = vector.shape_cast %157 : vector<1x8x32xbf16> to vector<8x32xbf16>
    %cst_98 = arith.constant dense<0.000000e+00> : vector<16x32xf32>
    %159 = tpu.matmul %156, %158, %cst_98 {dimension_numbers = #tpu.dot_dimension_numbers<[1], [0], [0], [1], [0, 0, 1, 1], [], []>} : vector<16x8xbf16>, vector<8x32xbf16>, vector<16x32xf32> -> vector<16x32xf32>
    %160 = arith.addf %154, %159 : vector<16x32xf32>
    %161 = vector.extract_strided_slice %141 {offsets = [3, 0, 0], sizes = [1, 16, 8], strides = [1, 1, 1]} : vector<4x16x8xbf16> to vector<1x16x8xbf16>
    %162 = vector.shape_cast %161 : vector<1x16x8xbf16> to vector<16x8xbf16>
    %c3_99 = arith.constant 3 : index
    %c0_100 = arith.constant 0 : index
    %c0_101 = arith.constant 0 : index
    %163 = vector.load %arg6[%c3_99, %c0_100, %c0_101] : memref<4x8x32xbf16, #tpu.memory_space<vmem>>, vector<1x8x32xbf16>
    %164 = vector.shape_cast %163 : vector<1x8x32xbf16> to vector<8x32xbf16>
    %cst_102 = arith.constant dense<0.000000e+00> : vector<16x32xf32>
    %165 = tpu.matmul %162, %164, %cst_102 {dimension_numbers = #tpu.dot_dimension_numbers<[1], [0], [0], [1], [0, 0, 1, 1], [], []>} : vector<16x8xbf16>, vector<8x32xbf16>, vector<16x32xf32> -> vector<16x32xf32>
    %166 = arith.addf %160, %165 : vector<16x32xf32>
    %c0_103 = arith.constant 0 : index
    %c0_104 = arith.constant 0 : index
    %167 = vector.load %arg7[%c0_103, %c0_104] : memref<1x32xf32, #tpu.memory_space<vmem>>, vector<1x32xf32>
    %168 = vector.broadcast %167 : vector<1x32xf32> to vector<16x32xf32>
    %169 = arith.addf %166, %168 : vector<16x32xf32>
    %170 = arith.addf %0, %169 : vector<16x32xf32>
    %c0_105 = arith.constant 0 : index
    %c0_106 = arith.constant 0 : index
    %171 = vector.load %arg8[%c0_105, %c0_106] : memref<1x32xf32, #tpu.memory_space<vmem>>, vector<1x32xf32>
    %c0_107 = arith.constant 0 : index
    %c0_108 = arith.constant 0 : index
    %172 = vector.load %arg9[%c0_107, %c0_108] : memref<1x32xf32, #tpu.memory_space<vmem>>, vector<1x32xf32>
    %cst_109 = arith.constant dense<0.000000e+00> : vector<16xf32>
    %173 = vector.multi_reduction <add>, %170, %cst_109 [1] : vector<16x32xf32> to vector<16xf32>
    %174 = vector.shape_cast %173 : vector<16xf32> to vector<16x1xf32>
    %cst_110 = arith.constant 3.200000e+01 : f32
    %175 = vector.broadcast %cst_110 : f32 to vector<16x1xf32>
    %176 = arith.divf %174, %175 : vector<16x1xf32>
    %177 = vector.broadcast %176 : vector<16x1xf32> to vector<16x32xf32>
    %178 = arith.subf %170, %177 : vector<16x32xf32>
    %179 = arith.mulf %178, %178 : vector<16x32xf32>
    %cst_111 = arith.constant dense<0.000000e+00> : vector<16xf32>
    %180 = vector.multi_reduction <add>, %179, %cst_111 [1] : vector<16x32xf32> to vector<16xf32>
    %181 = vector.shape_cast %180 : vector<16xf32> to vector<16x1xf32>
    %cst_112 = arith.constant 3.200000e+01 : f32
    %182 = vector.broadcast %cst_112 : f32 to vector<16x1xf32>
    %183 = arith.divf %181, %182 : vector<16x1xf32>
    %184 = vector.broadcast %176 : vector<16x1xf32> to vector<16x32xf32>
    %185 = arith.subf %170, %184 : vector<16x32xf32>
    %cst_113 = arith.constant 9.99999997E-7 : f32
    %186 = vector.broadcast %cst_113 : f32 to vector<16x1xf32>
    %187 = arith.addf %183, %186 : vector<16x1xf32>
    %188 = math.rsqrt %187 : vector<16x1xf32>
    %189 = vector.broadcast %188 : vector<16x1xf32> to vector<16x32xf32>
    %190 = arith.mulf %185, %189 : vector<16x32xf32>
    %191 = vector.broadcast %171 : vector<1x32xf32> to vector<16x32xf32>
    %192 = arith.mulf %190, %191 : vector<16x32xf32>
    %193 = vector.broadcast %172 : vector<1x32xf32> to vector<16x32xf32>
    %194 = arith.addf %192, %193 : vector<16x32xf32>
    %195 = arith.truncf %194 : vector<16x32xf32> to vector<16x32xbf16>
    %c0_114 = arith.constant 0 : index
    %c0_115 = arith.constant 0 : index
    %196 = vector.load %arg10[%c0_114, %c0_115] : memref<32x64xbf16, #tpu.memory_space<vmem>>, vector<32x64xbf16>
    %cst_116 = arith.constant dense<0.000000e+00> : vector<16x64xf32>
    %197 = tpu.matmul %195, %196, %cst_116 {dimension_numbers = #tpu.dot_dimension_numbers<[1], [0], [0], [1], [0, 0, 1, 1], [], []>} : vector<16x32xbf16>, vector<32x64xbf16>, vector<16x64xf32> -> vector<16x64xf32>
    %c0_117 = arith.constant 0 : index
    %c0_118 = arith.constant 0 : index
    %198 = vector.load %arg11[%c0_117, %c0_118] : memref<1x64xf32, #tpu.memory_space<vmem>>, vector<1x64xf32>
    %199 = vector.broadcast %198 : vector<1x64xf32> to vector<16x64xf32>
    %200 = arith.addf %197, %199 : vector<16x64xf32>
    %cst_119 = arith.constant 5.000000e-01 : f32
    %201 = vector.broadcast %cst_119 : f32 to vector<16x64xf32>
    %202 = arith.mulf %201, %200 : vector<16x64xf32>
    %cst_120 = arith.constant 4.471500e-02 : f32
    %203 = vector.broadcast %cst_120 : f32 to vector<16x64xf32>
    %204 = arith.mulf %203, %200 : vector<16x64xf32>
    %205 = arith.mulf %204, %200 : vector<16x64xf32>
    %206 = arith.mulf %205, %200 : vector<16x64xf32>
    %207 = arith.addf %200, %206 : vector<16x64xf32>
    %cst_121 = arith.constant 0.797884583 : f32
    %208 = vector.broadcast %cst_121 : f32 to vector<16x64xf32>
    %209 = arith.mulf %208, %207 : vector<16x64xf32>
    %210 = math.tanh %209 : vector<16x64xf32>
    %cst_122 = arith.constant 1.000000e+00 : f32
    %211 = vector.broadcast %cst_122 : f32 to vector<16x64xf32>
    %212 = arith.addf %211, %210 : vector<16x64xf32>
    %213 = arith.mulf %202, %212 : vector<16x64xf32>
    %214 = arith.truncf %213 : vector<16x64xf32> to vector<16x64xbf16>
    %c0_123 = arith.constant 0 : index
    %c0_124 = arith.constant 0 : index
    %215 = vector.load %arg12[%c0_123, %c0_124] : memref<64x32xbf16, #tpu.memory_space<vmem>>, vector<64x32xbf16>
    %cst_125 = arith.constant dense<0.000000e+00> : vector<16x32xf32>
    %216 = tpu.matmul %214, %215, %cst_125 {dimension_numbers = #tpu.dot_dimension_numbers<[1], [0], [0], [1], [0, 0, 1, 1], [], []>} : vector<16x64xbf16>, vector<64x32xbf16>, vector<16x32xf32> -> vector<16x32xf32>
    %c0_126 = arith.constant 0 : index
    %c0_127 = arith.constant 0 : index
    %217 = vector.load %arg13[%c0_126, %c0_127] : memref<1x32xf32, #tpu.memory_space<vmem>>, vector<1x32xf32>
    %218 = vector.broadcast %217 : vector<1x32xf32> to vector<16x32xf32>
    %219 = arith.addf %216, %218 : vector<16x32xf32>
    %220 = arith.addf %170, %219 : vector<16x32xf32>
    %c0_128 = arith.constant 0 : index
    %c0_129 = arith.constant 0 : index
    %221 = vector.load %arg14[%c0_128, %c0_129] : memref<16x32xf32, #tpu.memory_space<vmem>>, vector<16x32xf32>
    tpu.vector_store %arg14[%c0_128, %c0_129], %220 {strides = array<i32>} : memref<16x32xf32, #tpu.memory_space<vmem>>, vector<16x32xf32>,
    return
  }
  func.func @transform_0(%arg0: i32) -> (i32, i32) {
    %c0_i32 = arith.constant 0 : i32
    %c0_i32_0 = arith.constant 0 : i32
    return %arg0, %c0_i32 : i32, i32
  }
  func.func @transform_1(%arg0: i32) -> (i32, i32) {
    %c0_i32 = arith.constant 0 : i32
    %c0_i32_0 = arith.constant 0 : i32
    %c0_i32_1 = arith.constant 0 : i32
    return %c0_i32, %c0_i32_0 : i32, i32
  }
  func.func @transform_2(%arg0: i32) -> (i32, i32) {
    %c0_i32 = arith.constant 0 : i32
    %c0_i32_0 = arith.constant 0 : i32
    %c0_i32_1 = arith.constant 0 : i32
    return %c0_i32, %c0_i32_0 : i32, i32
  }
  func.func @transform_3(%arg0: i32) -> (i32, i32, i32) {
    %c0_i32 = arith.constant 0 : i32
    %c0_i32_0 = arith.constant 0 : i32
    %c0_i32_1 = arith.constant 0 : i32
    %c0_i32_2 = arith.constant 0 : i32
    return %c0_i32, %c0_i32_0, %c0_i32_1 : i32, i32, i32
  }
  func.func @transform_4(%arg0: i32) -> (i32, i32, i32) {
    %c0_i32 = arith.constant 0 : i32
    %c0_i32_0 = arith.constant 0 : i32
    %c0_i32_1 = arith.constant 0 : i32
    %c0_i32_2 = arith.constant 0 : i32
    return %c0_i32, %c0_i32_0, %c0_i32_1 : i32, i32, i32
  }
  func.func @transform_5(%arg0: i32) -> (i32, i32, i32) {
    %c0_i32 = arith.constant 0 : i32
    %c0_i32_0 = arith.constant 0 : i32
    %c0_i32_1 = arith.constant 0 : i32
    %c0_i32_2 = arith.constant 0 : i32
    return %c0_i32, %c0_i32_0, %c0_i32_1 : i32, i32, i32
  }
  func.func @transform_6(%arg0: i32) -> (i32, i32) {
    %c0_i32 = arith.constant 0 : i32
    %c0_i32_0 = arith.constant 0 : i32
    %c0_i32_1 = arith.constant 0 : i32
    return %c0_i32, %c0_i32_0 : i32, i32
  }
  func.func @transform_7(%arg0: i32) -> (i32, i32) {
    %c0_i32 = arith.constant 0 : i32
    %c0_i32_0 = arith.constant 0 : i32
    %c0_i32_1 = arith.constant 0 : i32
    return %c0_i32, %c0_i32_0 : i32, i32
  }
  func.func @transform_8(%arg0: i32) -> (i32, i32) {
    %c0_i32 = arith.constant 0 : i32
    %c0_i32_0 = arith.constant 0 : i32
    %c0_i32_1 = arith.constant 0 : i32
    return %c0_i32, %c0_i32_0 : i32, i32
  }
  func.func @transform_9(%arg0: i32) -> (i32, i32) {
    %c0_i32 = arith.constant 0 : i32
    %c0_i32_0 = arith.constant 0 : i32
    %c0_i32_1 = arith.constant 0 : i32
    return %c0_i32, %c0_i32_0 : i32, i32
  }
  func.func @transform_10(%arg0: i32) -> (i32, i32) {
    %c0_i32 = arith.constant 0 : i32
    %c0_i32_0 = arith.constant 0 : i32
    %c0_i32_1 = arith.constant 0 : i32
    return %c0_i32, %c0_i32_0 : i32, i32
  }
  func.func @transform_11(%arg0: i32) -> (i32, i32) {
    %c0_i32 = arith.constant 0 : i32
    %c0_i32_0 = arith.constant 0 : i32
    %c0_i32_1 = arith.constant 0 : i32
    return %c0_i32, %c0_i32_0 : i32, i32
  }
  func.func @transform_12(%arg0: i32) -> (i32, i32) {
    %c0_i32 = arith.constant 0 : i32
    %c0_i32_0 = arith.constant 0 : i32
    %c0_i32_1 = arith.constant 0 : i32
    return %c0_i32, %c0_i32_0 : i32, i32
  }
  func.func @transform_13(%arg0: i32) -> (i32, i32) {
    %c0_i32 = arith.constant 0 : i32
    %c0_i32_0 = arith.constant 0 : i32
    return %arg0, %c0_i32 : i32, i32
  }
}

</mosaic_0001>

<bundles_post_ra>
// kernel: tpu_custom_call.1
= control target key start
LH: loop header
LB: loop body
LE: loop exit
PB: predicated region body
PF: predicated region fallthrough
CT: control target
= control target key end

     0   :  { %s3413_s0 = inlined_call_operand.vmem [shape: f32[32,32], index: 0, kind: input, shape index: {}]   ;;  %s3414_s1 = inlined_call_operand.vmem [shape: f32[1,32], index: 1, kind: input, shape index: {}]   ;;  %s3415_s2 = inlined_call_operand.vmem [shape: f32[1,32], index: 2, kind: input, shape index: {}]   ;;  %s3416_s3 = inlined_call_operand.vmem [shape: bf16[12,32,8], index: 3, kind: input, shape index: {}]   ;;  %s3417_s4 = inlined_call_operand.vmem [shape: f32[12,1,8], index: 4, kind: input, shape index: {}]   ;;  %s3418_s5 = inlined_call_operand.vmem [shape: bf16[4,8,32], index: 5, kind: input, shape index: {}]   ;;  %s3419_s6 = inlined_call_operand.vmem [shape: f32[1,32], index: 6, kind: input, shape index: {}]   ;;  %s3420_s7 = inlined_call_operand.vmem [shape: f32[1,32], index: 7, kind: input, shape index: {}]   ;;  %s3421_s8 = inlined_call_operand.vmem [shape: f32[1,32], index: 8, kind: input, shape index: {}]   ;;  %s3422_s9 = inlined_call_operand.vmem [shape: bf16[32,64], index: 9, kind: input, shape index: {}]   ;;  %s3423_s10 = inlined_call_operand.vmem [shape: f32[1,64], index: 10, kind: input, shape index: {}]   ;;  %s3424_s11 = inlined_call_operand.vmem [shape: bf16[64,32], index: 11, kind: input, shape index: {}]   ;;  %s3425_s12 = inlined_call_operand.vmem [shape: f32[1,32], index: 12, kind: input, shape index: {}]   ;;  %s3426_s13 = inlined_call_operand.hbm [shape: f32[32,32], index: 13, kind: output, shape index: {}]  }
   0x1   :  { %3427 = sst [smem:[#allocation5_spill]] %s3413_s0 }
   0x2   :  { %3428 = sst [smem:[#allocation6_spill]] %s3414_s1 }
   0x3   :  { %18 = vsyncpa [#allocation3], 0 }
   0x4   :  { %20 = vsyncpa [#allocation3 + $0x1], 0  ;;  %s2923_s25 = smov 0   ;;  %s2925_s26 = smov 0  }
   0x5   :  { %s2927_s27 = smov 0   ;;  %s2929_s28 = smov 0  }
   0x6 LB: > { %s2944_s29 = sadd.s32 4294967295, %s2846_s28   ;;  %s2265_s30 = sadd.s32 4294967294, %s2846_s28   ;;  %s2846_s28 = sphi %s2929_s28, %s3436_s28   ;;  %s2842_s27 = sphi %s2927_s27, %s3435_s27   ;;  %s2838_s26 = sphi %s2925_s26, %s3434_s26   ;;  %s2834_s25 = sphi %s2923_s25, %s3433_s25  }
   0x7   : > { %s2948_s14 = sadd.s32 1, %s2846_s28   ;;  %s311_s15 = sadd.s32 1, %s2842_s27 }
   0x8   : > { %s308_s16 = ssub.s32 %s2846_s28, %s2948_s14  ;;  %p321_p0 = scmp.ne.s32.totalorder %s2842_s27, %s2838_s26 }
   0x9   : > { %p309_p1 = scmp.eq.s32.totalorder %s308_s16, 0  ;;  %p322_p2 = scmp.eq.s32.totalorder %s2944_s29, 1 }
   0xa   : > { %p327_p3 = scmp.ne.s32.totalorder %s2838_s26, %s2834_s25  ;;  %p328_p4 = scmp.eq.s32.totalorder %s2265_s30, 1 }
   0xb   : > { %s2959_s17 = scalar_select %p309_p1, %s2842_s27, %s311_s15  }
   0xc   : > { %p2961_p5 = por %p322_p2, %p321_p0  ;;  %p2965_p6 = por %p328_p4, %p327_p3 }
   0xd   : > { %p2268_p7 = scmp.ge.s32.totalorder %s2846_s28, 1  ;;  %p391_p8 = scmp.lt.s32.totalorder %s2846_s28, 3 }
   0xf   : > { %p392_p9 = pnand %p2268_p7, %p391_p8 }
  0x10   : > { %s2270_s20 = sshll.u32 (!%p392_p9), %s2944_s29, 1  ;;  %vm447_vm0 = vcmask (!%p392_p9), 261120   ;;  %s3431_s0 = sld [smem:[#allocation5_spill]] (!%p392_p9)  ;;  %v2710_v14 = vld [vmem:[%s3416_s3] sm:$0xff] (!%p392_p9)   ;;  %v2711_v15 = vld [vmem:[%s3416_s3 + $0x10] sm:$0xff] (!%p392_p9)   ;;  %v2848_v16 = vmov (!%p392_p9), 0.0  }
  0x11   : > { %395 = sbr.rel (%p392_p9) target bundleno = 2360 (0x938), region = 72  ;;  %p436_p10 = scmp.lt.s32.totalorder (!%p392_p9), %s2270_s20, 3  ;;  %2479 = vmatprep.subr.bf16.mxu0 (!%p392_p9), %v2848_v16  ;;  %2487 = vmatprep.subr.bf16.mxu1 (!%p392_p9), %v2848_v16  ;;  %v2712_v17 = vld [vmem:[%s3416_s3 + $0x8] sm:$0xff] (!%p392_p9)   ;;  %v2713_v18 = vld [vmem:[%s3416_s3 + $0x18] sm:$0xff] (!%p392_p9)   ;;  %vm2849_vm1 = vmmov (!%p392_p9), 0   ;;  %v2714_v35 = vld [vmem:[%s3416_s3 + $0x20] sm:$0xff] (!%p392_p9)  }
  0x12   : > { %2480 = vmatpush3.bf16.msra.mxu0 (!%p392_p9), %v2710_v14  ;;  %2488 = vmatpush3.bf16.msra.mxu1 (!%p392_p9), %v2711_v15  ;;  %s3432_s1 = sld [smem:[#allocation6_spill]] (!%p392_p9)  ;;  %v2273_v31 = vld [vmem:[%s3415_s2] ss:$0 sm:$0xff] (!%p392_p9)  ;;  %v2715_v36 = vld [vmem:[%s3416_s3 + $0x30] sm:$0xff] (!%p392_p9)   ;;  %v2716_v38 = vld [vmem:[%s3416_s3 + $0x28] sm:$0xff] (!%p392_p9)   ;;  %vm1297_vm2 = vcmask (!%p392_p9), 64512  }
  0x13   : > { %2481 = vmatprep.subr.bf16.mxu0 (!%p392_p9), %v2848_v16  ;;  %2489 = vmatprep.subr.bf16.mxu1 (!%p392_p9), %v2848_v16  ;;  %v2717_v39 = vld [vmem:[%s3416_s3 + $0x38] sm:$0xff] (!%p392_p9)   ;;  %v2718_v40 = vld [vmem:[%s3416_s3 + $0x40] sm:$0xff] (!%p392_p9)   ;;  %v2719_v41 = vld [vmem:[%s3416_s3 + $0x50] sm:$0xff] (!%p392_p9)   ;;  %vm1486_vm3 = vcmask (!%p392_p9), 130048   ;;  %vm1765_vm4 = vcmask (!%p392_p9), 1043456   ;;  %vm2140_vm5 = vcmask (!%p392_p9), 523264  }
  0x14   : > { %2483 = vmatprep.mubr.msk.bf16.mxu0 (!%p392_p9), %vm2849_vm1, %v2848_v16  ;;  %2491 = vmatprep.mubr.msk.bf16.mxu1 (!%p392_p9), %vm2849_vm1, %v2848_v16  ;;  %v2720_v42 = vld [vmem:[%s3416_s3 + $0x48] sm:$0xff] (!%p392_p9)   ;;  %v2721_v43 = vld [vmem:[%s3416_s3 + $0x58] sm:$0xff] (!%p392_p9)   ;;  %v2722_v44 = vld [vmem:[%s3416_s3 + $0x60] sm:$0xff] (!%p392_p9)   ;;  %s432_s30 = sand.u32 (!%p392_p9), 1, %s2838_s26   ;;  %s2410_s23 = sshll.u32 (!%p392_p9), %s2944_s29, 8 }
  0x15   : > { %v2723_v45 = vld [vmem:[%s3416_s3 + $0x70] sm:$0xff] (!%p392_p9)   ;;  %v2724_v46 = vld [vmem:[%s3416_s3 + $0x68] sm:$0xff] (!%p392_p9)   ;;  %v2725_v47 = vld [vmem:[%s3416_s3 + $0x78] sm:$0xff] (!%p392_p9)   ;;  %s2269_s15 = sshll.u32 (!%p392_p9), %s432_s30, 4  ;;  %s3372_s29 = scalar_lea.sflag (!%p392_p9), [#allocation3], %s432_s30 }
  0x16   : > { %2482 = vmatpush3.bf16.msra.mxu0 (!%p392_p9), %v2712_v17  ;;  %2490 = vmatpush3.bf16.msra.mxu1 (!%p392_p9), %v2713_v18  ;;  %v2726_v48 = vld [vmem:[%s3416_s3 + $0x80] sm:$0xff] (!%p392_p9)   ;;  %v2727_v49 = vld [vmem:[%s3416_s3 + $0x90] sm:$0xff] (!%p392_p9)   ;;  %v2728_v50 = vld [vmem:[%s3416_s3 + $0x88] sm:$0xff] (!%p392_p9)  }
  0x17   : > { %2495 = vmatprep.subr.bf16.mxu0 (!%p392_p9), %v2848_v16  ;;  %2503 = vmatprep.subr.bf16.mxu1 (!%p392_p9), %v2848_v16  ;;  %v2729_v51 = vld [vmem:[%s3416_s3 + $0x98] sm:$0xff] (!%p392_p9)   ;;  %v2730_v52 = vld [vmem:[%s3416_s3 + $0xa0] sm:$0xff] (!%p392_p9)   ;;  %v2731_v53 = vld [vmem:[%s3416_s3 + $0xb0] sm:$0xff] (!%p392_p9)  }
  0x18   : > { %s3438_s20 = smov (!%p436_p10, %s2270_s20), 3  ;;  %v2272_v27 = vld [vmem:[%s3432_s1] ss:$0 sm:$0xff]  ;;  %v2732_v54 = vld [vmem:[%s3416_s3 + $0xa8] sm:$0xff]   ;;  %v2733_v55 = vld [vmem:[%s3416_s3 + $0xb8] sm:$0xff]   ;;  %s3365_s1 = scalar_lea.hbm %s3426_s13, %s2410_s23 }
  0x19   : > { %s2271_s21 = sshll.u32 %s3438_s20, 3  ;;  %v2274_v56 = vld [vmem:[%s3417_s4] ss:$0 sm:$0xff]  ;;  %v2283_v58 = vld [vmem:[%s3417_s4 + $0x1] ss:$0 sm:$0xff] }
  0x1a   : > { %s439_s24 = scalar_lea.vmem %s3431_s0, %s2271_s21  ;;  %s434_s21 = scalar_lea.vmem [#allocation2], %s2269_s15 }
  0x1b   : > { %v2975_v0 = vld [vmem:[%s439_s24] sm:$0xff]  ;;  %v2977_v1 = vld [vmem:[%s439_s24 + $0x8] sm:$0xff]  ;;  %s2203_s22 = sshll.u32 %s434_s21, 4  ;;  %s2850_s0 = smov [#allocation2]   ;;  %s3367_s22 = int_to_ptr.vmem [resolvable:$true] %s2203_s22 }
  0x1c   : > { %v448_v2 = vsel %vm447_vm0, %v2975_v0, 0.0  ;;  %v451_v3 = vsel %vm447_vm0, %v2977_v1, 0.0  ;;  %s2784_s15 = scalar_lea.vmem %s3367_s22, 256  ;;  %s2788_s16 = sshll.u32 %s2850_s0, 4  ;;  %s2789_s16 = int_to_ptr.vmem [resolvable:$false] %s2788_s16 }
  0x1d   : > { %449 = vadd.xlane.f32.xlu0 %v448_v2  ;;  %p2785_p11 = scmp.ne.s32.totalorder %s3367_s22, %s2784_s15  ;;  %s2790_s20 = scalar_lea.vmem %s2789_s16, 512 }
  0x1e   : > { %p2791_p0 = scmp.lt.s32.totalorder %s3367_s22, %s2789_s16  ;;  %p2792_p1 = scmp.lt.s32.totalorder %s2790_s20, %s2784_s15 }
  0x1f   : > { %p2786_p12 = pnand %p2785_p11, %p2961_p5 }
  0x20   : > { %p2793_p2 = por %p2792_p1, %p2791_p0 }
  0x21   : > { %452 = vadd.xlane.f32.xlu0 %v451_v3  ;;  %p2787_p13 = pneg %p2786_p12 }
  0x23   : > { %p2794_p3 = pnand %p2793_p2, %p2787_p13 }
  0xaa   : > { %v450_v4 = vpop.xlane.xlu0 %449 }
  0xab   : > { %v455_v5 = vmul.f32 0.03125, %v450_v4 }
  0xad   : > { %v457_v6 = vsub.f32 %v2975_v0, %v455_v5 }
  0xae   : > { %v453_v7 = vpop.xlane.xlu0 %452 }
  0xaf   : > { %v456_v8 = vmul.f32 0.03125, %v453_v7  ;;  %v459_v9 = vmul.f32 %v457_v6, %v457_v6 }
  0xb1   : > { %v458_v10 = vsub.f32 %v2977_v1, %v456_v8  ;;  %v461_v11 = vsel %vm447_vm0, %v459_v9, 0.0 }
  0xb2   : > { %462 = vadd.xlane.f32.xlu1 %v461_v11 }
  0xb3   : > { %v460_v12 = vmul.f32 %v458_v10, %v458_v10 }
  0xb5   : > { %v464_v13 = vsel %vm447_vm0, %v460_v12, 0.0  ;;  %v2301_v12 = vld [vmem:[%s3417_s4 + $0x3] ss:$0 sm:$0xff] }
  0xb6   : > { %465 = vadd.xlane.f32.xlu1 %v464_v13 }
 0x13f   : > { %v463_v19 = vpop.xlane.xlu1 %462 }
 0x140   : > { %v467_v20 = vmul.f32 0.03125, %v463_v19 }
 0x142   : > { %v469_v21 = vadd.f32 1e-06, %v467_v20 }
 0x143   : > { %v466_v22 = vpop.xlane.xlu1 %465 }
 0x144   : > { %2740 = vrsqrt.f32 %v469_v21  ;;  %v468_v23 = vmul.f32 0.03125, %v466_v22 }
 0x146   : > { %v470_v24 = vadd.f32 1e-06, %v468_v23 }
 0x148   : > { %2742 = vrsqrt.f32 %v470_v24 }
 0x14e   : > { %v2741_v25 = vpop.eup %2740 }
 0x14f   : > { %v473_v26 = vmul.f32 %v2741_v25, %v457_v6 }
 0x151   : > { %v481_v29 = vmul.f32 %v2272_v27, %v473_v26 }
 0x152   : > { %v2743_v28 = vpop.eup %2742 }
 0x153   : > { %v474_v30 = vmul.f32 %v2743_v28, %v458_v10  ;;  %v489_v33 = vadd.f32 %v2273_v31, %v481_v29  ;;  %v2292_v10 = vld [vmem:[%s3417_s4 + $0x2] ss:$0 sm:$0xff]  ;;  %v2319_v29 = vld [vmem:[%s3417_s4 + $0x5] ss:$0 sm:$0xff] }
 0x155   : > { %v482_v32 = vmul.f32 %v2272_v27, %v474_v30  ;;  %v2310_v27 = vld [vmem:[%s3417_s4 + $0x4] ss:$0 sm:$0xff] }
 0x157   : > { %v490_v34 = vadd.f32 %v2273_v31, %v482_v32 }
 0x159   : > { %v3021_v37 = vpack.c.bf16 %v490_v34, %v489_v33 }
 0x15b   : > { %2484 = vmatmul.mubr.msk.bf16.vlgmr.msra.gmra.mrb[0].mxu0 %vm447_vm0, %v3021_v37  ;;  %2492 = vmatmul.mubr.msk.bf16.vlgmr.msra.gmra.mrb[0].mxu1 %vm447_vm0, %v3021_v37 }
 0x15c   : > { %2496 = vmatpush3.bf16.msra.mxu0 %v2714_v35  ;;  %2504 = vmatpush3.bf16.msra.mxu1 %v2715_v36 }
 0x15d   : > { %2497 = vmatprep.subr.bf16.mxu0 %v2848_v16  ;;  %2505 = vmatprep.subr.bf16.mxu1 %v2848_v16 }
 0x15e   : > { %2499 = vmatprep.mubr.msk.bf16.mxu0 %vm2849_vm1, %v2848_v16  ;;  %2507 = vmatprep.mubr.msk.bf16.mxu1 %vm2849_vm1, %v2848_v16 }
 0x160   : > { %2498 = vmatpush3.bf16.msra.mxu0 %v2716_v38  ;;  %2506 = vmatpush3.bf16.msra.mxu1 %v2717_v39 }
 0x161   : > { %2511 = vmatprep.subr.bf16.mxu0 %v2848_v16  ;;  %2519 = vmatprep.subr.bf16.mxu1 %v2848_v16 }
 0x163   : > { %2500 = vmatmul.mubr.msk.bf16.vlgmr.msra.gmra.mrb[4].mxu0 %vm447_vm0, %v3021_v37  ;;  %2508 = vmatmul.mubr.msk.bf16.vlgmr.msra.gmra.mrb[4].mxu1 %vm447_vm0, %v3021_v37 }
 0x164   : > { %2512 = vmatpush3.bf16.msra.mxu0 %v2718_v40  ;;  %2520 = vmatpush3.bf16.msra.mxu1 %v2719_v41 }
 0x165   : > { %2513 = vmatprep.subr.bf16.mxu0 %v2848_v16  ;;  %2521 = vmatprep.subr.bf16.mxu1 %v2848_v16 }
 0x166   : > { %2515 = vmatprep.mubr.msk.bf16.mxu0 %vm2849_vm1, %v2848_v16  ;;  %2523 = vmatprep.mubr.msk.bf16.mxu1 %vm2849_vm1, %v2848_v16 }
 0x168   : > { %2514 = vmatpush3.bf16.msra.mxu0 %v2720_v42  ;;  %2522 = vmatpush3.bf16.msra.mxu1 %v2721_v43 }
 0x169   : > { %2527 = vmatprep.subr.bf16.mxu0 %v2848_v16  ;;  %2535 = vmatprep.subr.bf16.mxu1 %v2848_v16 }
 0x16b   : > { %2516 = vmatmul.mubr.msk.bf16.vlgmr.msra.gmra.mrb[8].mxu0 %vm447_vm0, %v3021_v37  ;;  %2524 = vmatmul.mubr.msk.bf16.vlgmr.msra.gmra.mrb[8].mxu1 %vm447_vm0, %v3021_v37 }
 0x16c   : > { %2528 = vmatpush3.bf16.msra.mxu0 %v2722_v44  ;;  %2536 = vmatpush3.bf16.msra.mxu1 %v2723_v45  ;;  %v2328_v45 = vld [vmem:[%s3417_s4 + $0x6] ss:$0 sm:$0xff] }
 0x16d   : > { %2529 = vmatprep.subr.bf16.mxu0 %v2848_v16  ;;  %2537 = vmatprep.subr.bf16.mxu1 %v2848_v16 }
 0x16e   : > { %2531 = vmatprep.mubr.msk.bf16.mxu0 %vm2849_vm1, %v2848_v16  ;;  %2539 = vmatprep.mubr.msk.bf16.mxu1 %vm2849_vm1, %v2848_v16 }
 0x170   : > { %2530 = vmatpush3.bf16.msra.mxu0 %v2724_v46  ;;  %2538 = vmatpush3.bf16.msra.mxu1 %v2725_v47  ;;  %v2337_v47 = vld [vmem:[%s3417_s4 + $0x7] ss:$0 sm:$0xff] }
 0x171   : > { %2543 = vmatprep.subr.bf16.mxu0 %v2848_v16  ;;  %2551 = vmatprep.subr.bf16.mxu1 %v2848_v16 }
 0x173   : > { %2532 = vmatmul.mubr.msk.bf16.vlgmr.msra.gmra.mrb[12].mxu0 %vm447_vm0, %v3021_v37  ;;  %2540 = vmatmul.mubr.msk.bf16.vlgmr.msra.gmra.mrb[12].mxu1 %vm447_vm0, %v3021_v37 }
 0x174   : > { %2544 = vmatpush3.bf16.msra.mxu0 %v2726_v48  ;;  %2552 = vmatpush3.bf16.msra.mxu1 %v2727_v49 }
 0x175   : > { %2545 = vmatprep.subr.bf16.mxu0 %v2848_v16  ;;  %2553 = vmatprep.subr.bf16.mxu1 %v2848_v16 }
 0x176   : > { %2547 = vmatprep.mubr.msk.bf16.mxu0 %vm2849_vm1, %v2848_v16  ;;  %2555 = vmatprep.mubr.msk.bf16.mxu1 %vm2849_vm1, %v2848_v16 }
 0x178   : > { %2546 = vmatpush3.bf16.msra.mxu0 %v2728_v50  ;;  %2554 = vmatpush3.bf16.msra.mxu1 %v2729_v51 }
 0x179   : > { %2559 = vmatprep.subr.bf16.mxu0 %v2848_v16  ;;  %2567 = vmatprep.subr.bf16.mxu1 %v2848_v16 }
 0x17b   : > { %2548 = vmatmul.mubr.msk.bf16.vlgmr.msra.gmra.mrb[16].mxu0 %vm447_vm0, %v3021_v37  ;;  %2556 = vmatmul.mubr.msk.bf16.vlgmr.msra.gmra.mrb[16].mxu1 %vm447_vm0, %v3021_v37 }
 0x17c   : > { %2560 = vmatpush3.bf16.msra.mxu0 %v2730_v52  ;;  %2568 = vmatpush3.bf16.msra.mxu1 %v2731_v53 }
 0x17d   : > { %2561 = vmatprep.subr.bf16.mxu0 %v2848_v16  ;;  %2569 = vmatprep.subr.bf16.mxu1 %v2848_v16 }
 0x17e   : > { %2563 = vmatprep.mubr.msk.bf16.mxu0 %vm2849_vm1, %v2848_v16  ;;  %2571 = vmatprep.mubr.msk.bf16.mxu1 %vm2849_vm1, %v2848_v16 }
 0x180   : > { %2562 = vmatpush3.bf16.msra.mxu0 %v2732_v54  ;;  %2570 = vmatpush3.bf16.msra.mxu1 %v2733_v55 }
 0x181   : > { %2575 = vmatprep.subr.bf16.mxu0 %v2848_v16  ;;  %2581 = vmatprep.subr.bf16.mxu1 %v2848_v16 }
 0x183   : > { %2564 = vmatmul.mubr.msk.bf16.vlgmr.msra.gmra.mrb[20].mxu0 %vm447_vm0, %v3021_v37  ;;  %2572 = vmatmul.mubr.msk.bf16.vlgmr.msra.gmra.mrb[20].mxu1 %vm447_vm0, %v3021_v37 }
 0x184   : > { %2577 = vmatprep.mubr.msk.bf16.mxu0 %vm2849_vm1, %v2848_v16  ;;  %2583 = vmatprep.mubr.msk.bf16.mxu1 %vm2849_vm1, %v2848_v16 }
 0x22e   : > { %v552_v57 = vpop.f32.mrb[0].mxu0  ;;  %v618_v59 = vpop.f32.mrb[0].mxu1 }
 0x22f   : > { %v2485_v60 = vpop.f32.mrb[1].mxu0  ;;  %v2493_v61 = vpop.f32.mrb[1].mxu1  ;;  %v3151_v2 = vadd.f32 %v2274_v56, %v552_v57  ;;  %v3153_v3 = vadd.f32 %v2283_v58, %v618_v59 }
 0x230   : > { %v555_v62 = vpop.f32.mrb[2].mxu0  ;;  %v621_v63 = vpop.f32.mrb[2].mxu1 }
 0x231   : > { %v556_v4 = vadd.f32 %v2274_v56, %v555_v62  ;;  %v622_v5 = vadd.f32 %v2283_v58, %v621_v63  ;;  %v2486_v6 = vpop.f32.mrb[3].mxu0  ;;  %v2494_v7 = vpop.f32.mrb[3].mxu1  ;;  %v2346_v63 = vld [vmem:[%s3417_s4 + $0x8] ss:$0 sm:$0xff] }
 0x233   : > { %v757_v8 = vpack.c.bf16 %v556_v4, %v3151_v2  ;;  %v758_v9 = vpack.c.bf16 %v622_v5, %v3153_v3  ;;  %v2355_v3 = vld [vmem:[%s3417_s4 + $0x9] ss:$0 sm:$0xff] }
 0x236   : > { %v684_v11 = vpop.f32.mrb[4].mxu0  ;;  %v750_v13 = vpop.f32.mrb[4].mxu1 }
 0x237   : > { %v2501_v14 = vpop.f32.mrb[5].mxu0  ;;  %v2509_v15 = vpop.f32.mrb[5].mxu1  ;;  %v3163_v19 = vadd.f32 %v2292_v10, %v684_v11  ;;  %v3165_v20 = vadd.f32 %v2301_v12, %v750_v13 }
 0x238   : > { %v687_v17 = vpop.f32.mrb[6].mxu0  ;;  %v753_v18 = vpop.f32.mrb[6].mxu1 }
 0x239   : > { %v3167_v21 = vadd.f32 %v2292_v10, %v687_v17  ;;  %v3169_v22 = vadd.f32 %v2301_v12, %v753_v18  ;;  %v2502_v23 = vpop.f32.mrb[7].mxu0  ;;  %v2510_v24 = vpop.f32.mrb[7].mxu1  ;;  %v2364_v18 = vld [vmem:[%s3417_s4 + $0xa] ss:$0 sm:$0xff] }
 0x23a   : > { %v2373_v24 = vld [vmem:[%s3417_s4 + $0xb] ss:$0 sm:$0xff] }
 0x23b   : > { %v759_v25 = vpack.c.bf16 %v3167_v21, %v3163_v19  ;;  %v760_v26 = vpack.c.bf16 %v3169_v22, %v3165_v20 }
 0x23e   : > { %v820_v28 = vpop.f32.mrb[8].mxu0  ;;  %v886_v30 = vpop.f32.mrb[8].mxu1 }
 0x23f   : > { %v2517_v31 = vpop.f32.mrb[9].mxu0  ;;  %v2525_v32 = vpop.f32.mrb[9].mxu1  ;;  %v821_v35 = vadd.f32 %v2310_v27, %v820_v28  ;;  %v887_v36 = vadd.f32 %v2319_v29, %v886_v30 }
 0x240   : > { %v823_v33 = vpop.f32.mrb[10].mxu0  ;;  %v889_v34 = vpop.f32.mrb[10].mxu1 }
 0x241   : > { %v824_v37 = vadd.f32 %v2310_v27, %v823_v33  ;;  %v890_v38 = vadd.f32 %v2319_v29, %v889_v34  ;;  %v2518_v39 = vpop.f32.mrb[11].mxu0  ;;  %v2526_v40 = vpop.f32.mrb[11].mxu1 }
 0x243   : > { %v1025_v41 = vpack.c.bf16 %v824_v37, %v821_v35  ;;  %v1026_v42 = vpack.c.bf16 %v890_v38, %v887_v36 }
 0x245   : > { %v1302_v43 = vsel %vm1297_vm2, %v1025_v41, 0  ;;  %v1349_v44 = vsel %vm1297_vm2, %v1026_v42, 0 }
 0x246   : > { %v952_v46 = vpop.f32.mrb[12].mxu0  ;;  %v1018_v48 = vpop.f32.mrb[12].mxu1  ;;  %2576 = vmatpush3.bf16.xpose.msra.mxu0 %v1302_v43  ;;  %2582 = vmatpush3.bf16.xpose.msra.mxu1 %v1349_v44 }
 0x247   : > { %v2533_v49 = vpop.f32.mrb[13].mxu0  ;;  %v2541_v50 = vpop.f32.mrb[13].mxu1  ;;  %2587 = vmatprep.subr.bf16.mxu0 %v2848_v16  ;;  %2593 = vmatprep.subr.bf16.mxu1 %v2848_v16  ;;  %v953_v53 = vadd.f32 %v2328_v45, %v952_v46  ;;  %v1019_v54 = vadd.f32 %v2337_v47, %v1018_v48 }
 0x248   : > { %v955_v51 = vpop.f32.mrb[14].mxu0  ;;  %v1021_v52 = vpop.f32.mrb[14].mxu1 }
 0x249   : > { %v956_v55 = vadd.f32 %v2328_v45, %v955_v51  ;;  %v1022_v56 = vadd.f32 %v2337_v47, %v1021_v52  ;;  %v2534_v57 = vpop.f32.mrb[15].mxu0  ;;  %v2542_v58 = vpop.f32.mrb[15].mxu1 }
 0x24b   : > { %v1027_v59 = vpack.c.bf16 %v956_v55, %v953_v53  ;;  %v1028_v60 = vpack.c.bf16 %v1022_v56, %v1019_v54 }
 0x24d   : > { %2578 = vmatmul.mubr.msk.bf16.vlgmr.msra.gmra.mrb[24].mxu0 %vm1297_vm2, %v757_v8  ;;  %2584 = vmatmul.mubr.msk.bf16.vlgmr.msra.gmra.mrb[24].mxu1 %vm1297_vm2, %v758_v9  ;;  %v1396_v61 = vsel %vm1297_vm2, %v1027_v59, 0  ;;  %v1443_v62 = vsel %vm1297_vm2, %v1028_v60, 0 }
 0x24e   : > { %v1088_v2 = vpop.f32.mrb[16].mxu0  ;;  %v1154_v4 = vpop.f32.mrb[16].mxu1  ;;  %2588 = vmatpush3.bf16.xpose.msra.mxu0 %v1396_v61  ;;  %2594 = vmatpush3.bf16.xpose.msra.mxu1 %v1443_v62 }
 0x24f   : > { %v2549_v5 = vpop.f32.mrb[17].mxu0  ;;  %v2557_v6 = vpop.f32.mrb[17].mxu1  ;;  %2589 = vmatprep.mubr.msk.bf16.mxu0 %vm2849_vm1, %v2848_v16  ;;  %2595 = vmatprep.mubr.msk.bf16.mxu1 %vm2849_vm1, %v2848_v16  ;;  %v1089_v9 = vadd.f32 %v2346_v63, %v1088_v2  ;;  %v1155_v10 = vadd.f32 %v2355_v3, %v1154_v4 }
 0x250   : > { %v1091_v7 = vpop.f32.mrb[18].mxu0  ;;  %v1157_v8 = vpop.f32.mrb[18].mxu1  ;;  %2599 = vmatprep.subr.bf16.mxu0 %v2848_v16  ;;  %2605 = vmatprep.subr.bf16.mxu1 %v2848_v16 }
 0x251   : > { %v1092_v11 = vadd.f32 %v2346_v63, %v1091_v7  ;;  %v1158_v12 = vadd.f32 %v2355_v3, %v1157_v8  ;;  %v2550_v13 = vpop.f32.mrb[19].mxu0  ;;  %v2558_v14 = vpop.f32.mrb[19].mxu1 }
 0x253   : > { %v1293_v15 = vpack.c.bf16 %v1092_v11, %v1089_v9  ;;  %v1294_v17 = vpack.c.bf16 %v1158_v12, %v1155_v10 }
 0x255   : > { %2590 = vmatmul.mubr.msk.bf16.vlgmr.msra.gmra.mrb[28].mxu0 %vm1297_vm2, %v759_v25  ;;  %2596 = vmatmul.mubr.msk.bf16.vlgmr.msra.gmra.mrb[28].mxu1 %vm1297_vm2, %v760_v26 }
 0x256   : > { %v1220_v23 = vpop.f32.mrb[20].mxu0  ;;  %v1286_v27 = vpop.f32.mrb[20].mxu1  ;;  %2600 = vmatpush3.bf16.msra.mxu0 %v1293_v15  ;;  %2606 = vmatpush3.bf16.msra.mxu1 %v1294_v17 }
 0x257   : > { %v2565_v19 = vpop.f32.mrb[21].mxu0  ;;  %v2573_v21 = vpop.f32.mrb[21].mxu1  ;;  %2601 = vmatprep.mubr.msk.bf16.mxu0 %vm2849_vm1, %v2848_v16  ;;  %2611 = vmatprep.subr.bf16.mxu0 %v2848_v16  ;;  %v3227_v25 = vadd.f32 %v2364_v18, %v1220_v23  ;;  %v3229_v26 = vadd.f32 %v2373_v24, %v1286_v27 }
 0x258   : > { %v1223_v20 = vpop.f32.mrb[22].mxu0  ;;  %v1289_v22 = vpop.f32.mrb[22].mxu1  ;;  %2607 = vmatprep.mubr.msk.bf16.mxu1 %vm2849_vm1, %v2848_v16  ;;  %2617 = vmatprep.subr.bf16.mxu1 %v2848_v16 }
 0x259   : > { %v3231_v28 = vadd.f32 %v2364_v18, %v1223_v20  ;;  %v3233_v29 = vadd.f32 %v2373_v24, %v1289_v22  ;;  %v2566_v30 = vpop.f32.mrb[23].mxu0  ;;  %v2574_v31 = vpop.f32.mrb[23].mxu1 }
 0x25b   : > { %v1295_v32 = vpack.c.bf16 %v3231_v28, %v3227_v25  ;;  %v1296_v33 = vpack.c.bf16 %v3233_v29, %v3229_v26  ;;  %v1759_v26 = vld [vmem:[%s3418_s5] sm:$0xf] }
 0x25c   : > { %v1814_v29 = vsel %vm1765_vm4, %v1759_v26, 0 }
 0x320   : > { %v1338_v34 = vpop.f32.mrb[24].mxu0  ;;  %v1385_v35 = vpop.f32.mrb[24].mxu1 }
 0x321   : > { %v2579_v36 = vpop.f32.mrb[25].mxu0  ;;  %v2585_v37 = vpop.f32.mrb[25].mxu1  ;;  %v1487_v38 = vsel %vm1486_vm3, %v1338_v34, -inf  ;;  %v1493_v44 = vsel %vm1486_vm3, %v1385_v35, -inf }
 0x322   : > { %v1388_v39 = vpop.f32.mrb[26].mxu1  ;;  %1488 = vmax.xlane.f32.xlu0 %v1487_v38  ;;  %v1341_v40 = vpop.f32.mrb[26].mxu0 }
 0x323   : > { %v2580_v41 = vpop.f32.mrb[27].mxu0  ;;  %v2586_v42 = vpop.f32.mrb[27].mxu1  ;;  %v1490_v43 = vsel %vm1486_vm3, %v1341_v40, -inf  ;;  %v1496_v45 = vsel %vm1486_vm3, %v1388_v39, -inf }
 0x324   : > { %1491 = vmax.xlane.f32.xlu1 %v1490_v43 }
 0x326   : > { %1494 = vmax.xlane.f32.xlu0 %v1493_v44 }
 0x328   : > { %v1479_v46 = vpop.f32.mrb[28].mxu1  ;;  %1497 = vmax.xlane.f32.xlu1 %v1496_v45  ;;  %v1432_v47 = vpop.f32.mrb[28].mxu0 }
 0x329   : > { %v2591_v48 = vpop.f32.mrb[29].mxu0  ;;  %v2597_v49 = vpop.f32.mrb[29].mxu1  ;;  %v1499_v50 = vsel %vm1486_vm3, %v1432_v47, -inf  ;;  %v1505_v56 = vsel %vm1486_vm3, %v1479_v46, -inf }
 0x32a   : > { %v1482_v51 = vpop.f32.mrb[30].mxu1  ;;  %1500 = vmax.xlane.f32.xlu0 %v1499_v50  ;;  %v1435_v52 = vpop.f32.mrb[30].mxu0 }
 0x32b   : > { %v2592_v53 = vpop.f32.mrb[31].mxu0  ;;  %v2598_v54 = vpop.f32.mrb[31].mxu1  ;;  %v1502_v55 = vsel %vm1486_vm3, %v1435_v52, -inf  ;;  %v1508_v57 = vsel %vm1486_vm3, %v1482_v51, -inf }
 0x32c   : > { %1503 = vmax.xlane.f32.xlu1 %v1502_v55 }
 0x32e   : > { %1506 = vmax.xlane.f32.xlu0 %v1505_v56 }
 0x330   : > { %1509 = vmax.xlane.f32.xlu1 %v1508_v57 }
 0x3af   : > { %v1489_v58 = vpop.xlane.xlu0 %1488 }
 0x3b0   : > { %v1511_v59 = vsub.f32 %v1338_v34, %v1489_v58 }
 0x3b1   : > { %v1492_v60 = vpop.xlane.xlu1 %1491 }
 0x3b2   : > { %v1519_v61 = vmul.f32 1.442695, %v1511_v59  ;;  %v1512_v62 = vsub.f32 %v1341_v40, %v1492_v60 }
 0x3b3   : > { %v1495_v63 = vpop.xlane.xlu0 %1494 }
 0x3b4   : > { %2744 = vpow2.f32 %v1519_v61  ;;  %v1521_v2 = vmul.f32 1.442695, %v1512_v62  ;;  %v1513_v3 = vsub.f32 %v1385_v35, %v1495_v63 }
 0x3b5   : > { %v1498_v4 = vpop.xlane.xlu1 %1497 }
 0x3b6   : > { %2746 = vpow2.f32 %v1521_v2  ;;  %v1523_v5 = vmul.f32 1.442695, %v1513_v3  ;;  %v1514_v6 = vsub.f32 %v1388_v39, %v1498_v4 }
 0x3b7   : > { %v1501_v7 = vpop.xlane.xlu0 %1500 }
 0x3b8   : > { %2748 = vpow2.f32 %v1523_v5  ;;  %v1525_v8 = vmul.f32 1.442695, %v1514_v6  ;;  %v1515_v9 = vsub.f32 %v1432_v47, %v1501_v7 }
 0x3b9   : > { %v1504_v10 = vpop.xlane.xlu1 %1503 }
 0x3ba   : > { %2750 = vpow2.f32 %v1525_v8  ;;  %v1527_v11 = vmul.f32 1.442695, %v1515_v9  ;;  %v1516_v12 = vsub.f32 %v1435_v52, %v1504_v10  ;;  %v2390_v8 = vld [vmem:[%s3418_s5 + $0xc] sm:$0xf] }
 0x3bb   : > { %v1507_v13 = vpop.xlane.xlu0 %1506 }
 0x3bc   : > { %2752 = vpow2.f32 %v1527_v11  ;;  %v1529_v14 = vmul.f32 1.442695, %v1516_v12  ;;  %v1517_v15 = vsub.f32 %v1479_v46, %v1507_v13  ;;  %v1914_v13 = vsel %vm1765_vm4, %v2390_v8, 0  ;;  %v2735_v8 = vld [vmem:[%s3422_s9 + $0x8] sm:$0xff]  }
 0x3bd   : > { %v1510_v17 = vpop.xlane.xlu1 %1509 }
 0x3be   : > { %v2745_v18 = vpop.eup %2744  ;;  %2754 = vpow2.f32 %v1529_v14  ;;  %v1531_v23 = vmul.f32 1.442695, %v1517_v15  ;;  %v1518_v24 = vsub.f32 %v1482_v51, %v1510_v17  ;;  %v2388_v15 = vld [vmem:[%s3418_s5 + $0x8] sm:$0xf] }
 0x3bf   : > { %v1535_v27 = vsel %vm1486_vm3, %v2745_v18, 0.0 }
 0x3c0   : > { %v2747_v19 = vpop.eup %2746  ;;  %2756 = vpow2.f32 %v1531_v23  ;;  %v1533_v21 = vmul.f32 1.442695, %v1518_v24  ;;  %1536 = vadd.xlane.f32.xlu0 %v1535_v27  ;;  %v1863_v27 = vsel %vm1765_vm4, %v2388_v15, 0 }
 0x3c1   : > { %v1538_v20 = vsel %vm1486_vm3, %v2747_v19, 0.0 }
 0x3c2   : > { %v2749_v22 = vpop.eup %2748  ;;  %2758 = vpow2.f32 %v1533_v21  ;;  %1539 = vadd.xlane.f32.xlu1 %v1538_v20 }
 0x3c3   : > { %v1541_v30 = vsel %vm1486_vm3, %v2749_v22, 0.0 }
 0x3c4   : > { %v2751_v31 = vpop.eup %2750  ;;  %1542 = vadd.xlane.f32.xlu0 %v1541_v30 }
 0x3c5   : > { %v1544_v34 = vsel %vm1486_vm3, %v2751_v31, 0.0 }
 0x3c6   : > { %v2753_v35 = vpop.eup %2752  ;;  %1545 = vadd.xlane.f32.xlu1 %v1544_v34 }
 0x3c7   : > { %v1547_v36 = vsel %vm1486_vm3, %v2753_v35, 0.0 }
 0x3c8   : > { %v2755_v37 = vpop.eup %2754  ;;  %1548 = vadd.xlane.f32.xlu0 %v1547_v36 }
 0x3c9   : > { %v1550_v38 = vsel %vm1486_vm3, %v2755_v37, 0.0 }
 0x3ca   : > { %v2757_v39 = vpop.eup %2756  ;;  %1551 = vadd.xlane.f32.xlu1 %v1550_v38 }
 0x3cb   : > { %v1553_v40 = vsel %vm1486_vm3, %v2757_v39, 0.0 }
 0x3cc   : > { %v2759_v41 = vpop.eup %2758  ;;  %1554 = vadd.xlane.f32.xlu0 %v1553_v40 }
 0x3cd   : > { %v1556_v42 = vsel %vm1486_vm3, %v2759_v41, 0.0 }
 0x3ce   : > { %1557 = vadd.xlane.f32.xlu1 %v1556_v42 }
 0x44d   : > { %v1537_v43 = vpop.xlane.xlu0 %1536 }
 0x44e   : > { %2760 = vrcp.f32 %v1537_v43 }
 0x44f   : > { %v1540_v44 = vpop.xlane.xlu1 %1539 }
 0x450   : > { %2762 = vrcp.f32 %v1540_v44 }
 0x451   : > { %v1543_v45 = vpop.xlane.xlu0 %1542 }
 0x452   : > { %2764 = vrcp.f32 %v1543_v45 }
 0x453   : > { %v1546_v46 = vpop.xlane.xlu1 %1545 }
 0x454   : > { %2766 = vrcp.f32 %v1546_v46 }
 0x455   : > { %v1549_v47 = vpop.xlane.xlu0 %1548 }
 0x456   : > { %2768 = vrcp.f32 %v1549_v47 }
 0x457   : > { %v1552_v48 = vpop.xlane.xlu1 %1551 }
 0x458   : > { %v2761_v49 = vpop.eup %2760  ;;  %2770 = vrcp.f32 %v1552_v48 }
 0x459   : > { %v1555_v50 = vpop.xlane.xlu0 %1554  ;;  %v1567_v52 = vmul.f32 %v2761_v49, %v2745_v18 }
 0x45a   : > { %v2763_v51 = vpop.eup %2762  ;;  %2772 = vrcp.f32 %v1555_v50 }
 0x45b   : > { %v1568_v53 = vmul.f32 %v2763_v51, %v2747_v19  ;;  %v1558_v54 = vpop.xlane.xlu1 %1557 }
 0x45c   : > { %v2765_v55 = vpop.eup %2764  ;;  %2774 = vrcp.f32 %v1558_v54 }
 0x45d   : > { %v1575_v56 = vpack.c.bf16 %v1568_v53, %v1567_v52  ;;  %v1569_v58 = vmul.f32 %v2765_v55, %v2749_v22  ;;  %v2392_v53 = vld [vmem:[%s3419_s6] ss:$0 sm:$0xff] }
 0x45e   : > { %v2767_v57 = vpop.eup %2766 }
 0x45f   : > { %v1570_v59 = vmul.f32 %v2767_v57, %v2751_v31  ;;  %2602 = vmatmul.mubr.msk.bf16.vlgmr.msra.gmra.mrb[32].mxu0 %vm1486_vm3, %v1575_v56 }
 0x460   : > { %v2769_v60 = vpop.eup %2768  ;;  %2612 = vmatpush3.bf16.msra.mxu0 %v1295_v32  ;;  %2613 = vmatprep.mubr.msk.bf16.mxu0 %vm2849_vm1, %v2848_v16 }
 0x461   : > { %v1576_v61 = vpack.c.bf16 %v1570_v59, %v1569_v58  ;;  %2623 = vmatprep.subr.bf16.mxu0 %v2848_v16  ;;  %v1571_v63 = vmul.f32 %v2769_v60, %v2753_v35 }
 0x462   : > { %v2771_v62 = vpop.eup %2770 }
 0x463   : > { %v1572_v2 = vmul.f32 %v2771_v62, %v2755_v37  ;;  %2608 = vmatmul.mubr.msk.bf16.vlgmr.msra.gmra.mrb[32].mxu1 %vm1486_vm3, %v1576_v61 }
 0x464   : > { %v2773_v3 = vpop.eup %2772  ;;  %2618 = vmatpush3.bf16.msra.mxu1 %v1296_v33  ;;  %2619 = vmatprep.mubr.msk.bf16.mxu1 %vm2849_vm1, %v2848_v16  ;;  %v2385_v33 = vld [vmem:[%s3418_s5 + $0x4] sm:$0xf] }
 0x465   : > { %v1577_v25 = vpack.c.bf16 %v1572_v2, %v1571_v63  ;;  %2629 = vmatprep.subr.bf16.mxu1 %v2848_v16  ;;  %v1573_v32 = vmul.f32 %v2773_v3, %v2757_v39  ;;  %v1767_v6 = vsel %vm1765_vm4, %v2385_v33, 0 }
 0x466   : > { %v2775_v28 = vpop.eup %2774 }
 0x467   : > { %v1574_v4 = vmul.f32 %v2775_v28, %v2759_v41  ;;  %2614 = vmatmul.mubr.msk.bf16.vlgmr.msra.gmra.mrb[36].mxu0 %vm1486_vm3, %v1577_v25 }
 0x468   : > { %2625 = vmatprep.mubr.msk.bf16.mxu0 %vm2849_vm1, %v2848_v16  ;;  %2624 = vmatpush3.bf16.msra.mxu0 %v1767_v6 }
 0x469   : > { %v1578_v5 = vpack.c.bf16 %v1574_v4, %v1573_v32  ;;  %2635 = vmatprep.subr.bf16.mxu0 %v2848_v16 }
 0x46b   : > { %2620 = vmatmul.mubr.msk.bf16.vlgmr.msra.gmra.mrb[36].mxu1 %vm1486_vm3, %v1578_v5 }
 0x46c   : > { %2631 = vmatprep.mubr.msk.bf16.mxu1 %vm2849_vm1, %v2848_v16  ;;  %2630 = vmatpush3.bf16.msra.mxu1 %v1814_v29 }
 0x46d   : > { %2641 = vmatprep.subr.bf16.mxu1 %v2848_v16 }
 0x532   : > { %v1616_v7 = vpop.f32.mrb[32].mxu0 }
 0x533   : > { %v2603_v9 = vpop.f32.mrb[33].mxu0 }
 0x534   : > { %v1619_v10 = vpop.f32.mrb[34].mxu0 }
 0x535   : > { %v1755_v11 = vpack.c.bf16 %v1619_v10, %v1616_v7  ;;  %v2604_v12 = vpop.f32.mrb[35].mxu0  ;;  %v2734_v7 = vld [vmem:[%s3422_s9] sm:$0xff]  }
 0x536   : > { %v1660_v14 = vpop.f32.mrb[32].mxu1 }
 0x537   : > { %v2609_v17 = vpop.f32.mrb[33].mxu1  ;;  %2632 = vmatmul.mubr.msk.bf16.vlgmr.msra.gmra.mrb[40].mxu1 %vm1297_vm2, %v1755_v11 }
 0x538   : > { %v1663_v18 = vpop.f32.mrb[34].mxu1  ;;  %2642 = vmatpush3.bf16.msra.mxu1 %v1914_v13  ;;  %2643 = vmatprep.mubr.msk.bf16.mxu1 %vm2849_vm1, %v2848_v16  ;;  %v2393_v17 = vld [vmem:[%s3420_s7] ss:$0 sm:$0xff] }
 0x539   : > { %v1756_v23 = vpack.c.bf16 %v1663_v18, %v1660_v14  ;;  %v2610_v24 = vpop.f32.mrb[35].mxu1  ;;  %2655 = vmatprep.subr.bf16.mxu1 %v2848_v16 }
 0x53a   : > { %v1704_v19 = vpop.f32.mrb[36].mxu0 }
 0x53b   : > { %v2615_v21 = vpop.f32.mrb[37].mxu0  ;;  %2626 = vmatmul.mubr.msk.bf16.vlgmr.msra.gmra.mrb[40].mxu0 %vm1297_vm2, %v1756_v23 }
 0x53c   : > { %v1707_v20 = vpop.f32.mrb[38].mxu0  ;;  %2636 = vmatpush3.bf16.msra.mxu0 %v1863_v27  ;;  %2637 = vmatprep.mubr.msk.bf16.mxu0 %vm2849_vm1, %v2848_v16 }
 0x53d   : > { %v1757_v22 = vpack.c.bf16 %v1707_v20, %v1704_v19  ;;  %v2616_v30 = vpop.f32.mrb[39].mxu0  ;;  %2647 = vmatprep.subr.bf16.mxu0 %v2848_v16  ;;  %v2394_v19 = vld [vmem:[%s3421_s8] ss:$0 sm:$0xff] }
 0x53e   : > { %v1748_v31 = vpop.f32.mrb[36].mxu1 }
 0x53f   : > { %v2621_v34 = vpop.f32.mrb[37].mxu1 }
 0x540   : > { %v1751_v35 = vpop.f32.mrb[38].mxu1  ;;  %v2737_v34 = vld [vmem:[%s3424_s11 + $0x8] sm:$0xff]  }
 0x541   : > { %v1758_v36 = vpack.c.bf16 %v1751_v35, %v1748_v31  ;;  %v2622_v37 = vpop.f32.mrb[39].mxu1  ;;  %v2736_v31 = vld [vmem:[%s3424_s11] sm:$0xff]   ;;  %v2738_v35 = vld [vmem:[%s3424_s11 + $0x10] sm:$0xff]  }
 0x542   : > { %v2395_v37 = vld [vmem:[%s3423_s10] ss:$0 sm:$0xff] }
 0x543   : > { %2638 = vmatmul.mubr.msk.bf16.vlgmr.msra.gmra.mrb[44].mxu0 %vm1297_vm2, %v1757_v22  ;;  %2644 = vmatmul.mubr.msk.bf16.vlgmr.msra.gmra.mrb[44].mxu1 %vm1297_vm2, %v1758_v36  ;;  %v2739_v36 = vld [vmem:[%s3424_s11 + $0x18] sm:$0xff]  }
 0x544   : > { %2651 = vmatprep.mubr.msk.bf16.mxu0 %vm2849_vm1, %v2848_v16  ;;  %2663 = vmatprep.mubr.msk.bf16.mxu1 %vm2849_vm1, %v2848_v16 }
 0x545   : > { %2648 = vmatpush3.bf16.msra.mxu0 %v2734_v7  ;;  %2656 = vmatpush3.bf16.msra.mxu1 %v2736_v31 }
 0x546   : > { %2649 = vmatprep.subr.bf16.mxu0 %v2848_v16  ;;  %2657 = vmatprep.subr.bf16.mxu1 %v2848_v16 }
 0x549   : > { %2650 = vmatpush3.bf16.msra.mxu0 %v2735_v8  ;;  %2658 = vmatpush3.bf16.msra.mxu1 %v2737_v34 }
 0x54a   : > { %2659 = vmatprep.subr.bf16.mxu1 %v2848_v16 }
 0x54d   : > { %2660 = vmatpush3.bf16.msra.mxu1 %v2738_v35 }
 0x54e   : > { %2661 = vmatprep.subr.bf16.mxu1 %v2848_v16 }
 0x551   : > { %2662 = vmatpush3.bf16.msra.mxu1 %v2739_v36 }
 0x60a   : > { %v1850_v38 = vpop.f32.mrb[40].mxu1 }
 0x60b   : > { %v2633_v39 = vpop.f32.mrb[41].mxu1 }
 0x60c   : > { %v1853_v40 = vpop.f32.mrb[42].mxu1 }
 0x60d   : > { %v2634_v41 = vpop.f32.mrb[43].mxu1 }
 0x60e   : > { %v1803_v42 = vpop.f32.mrb[40].mxu0 }
 0x60f   : > { %v1851_v43 = vadd.f32 %v1850_v38, %v1803_v42  ;;  %v2627_v44 = vpop.f32.mrb[41].mxu0 }
 0x610   : > { %v1806_v45 = vpop.f32.mrb[42].mxu0 }
 0x611   : > { %v1854_v46 = vadd.f32 %v1853_v40, %v1806_v45  ;;  %v2628_v47 = vpop.f32.mrb[43].mxu0 }
 0x616   : > { %v1899_v48 = vpop.f32.mrb[44].mxu0  ;;  %v1950_v49 = vpop.f32.mrb[44].mxu1 }
 0x617   : > { %v1906_v50 = vadd.f32 %v1899_v48, %v1851_v43  ;;  %v2639_v51 = vpop.f32.mrb[45].mxu0  ;;  %v2645_v52 = vpop.f32.mrb[45].mxu1 }
 0x618   : > { %v1902_v54 = vpop.f32.mrb[46].mxu0  ;;  %v1953_v55 = vpop.f32.mrb[46].mxu1 }
 0x619   : > { %v1957_v56 = vadd.f32 %v1950_v49, %v1906_v50  ;;  %v1907_v57 = vadd.f32 %v1902_v54, %v1854_v46  ;;  %v2640_v58 = vpop.f32.mrb[47].mxu0  ;;  %v2646_v59 = vpop.f32.mrb[47].mxu1 }
 0x61b   : > { %v1966_v60 = vadd.f32 %v2392_v53, %v1957_v56  ;;  %v1958_v61 = vadd.f32 %v1953_v55, %v1907_v57 }
 0x61d   : > { %v3311_v62 = vadd.f32 %v1966_v60, %v2975_v0  ;;  %v1967_v63 = vadd.f32 %v2392_v53, %v1958_v61 }
 0x61f   : > { %v3314_v2 = vadd.f32 %v1967_v63, %v2977_v1  ;;  %v1972_v3 = vsel %vm447_vm0, %v3311_v62, 0.0  ;;  %v2399_v63 = vld [vmem:[%s3425_s12] ss:$0 sm:$0xff] }
 0x620   : > { %1973 = vadd.xlane.f32.xlu0 %v1972_v3 }
 0x621   : > { %v1975_v25 = vsel %vm447_vm0, %v3314_v2, 0.0 }
 0x622   : > { %1976 = vadd.xlane.f32.xlu1 %v1975_v25 }
 0x6ad   : > { %v1974_v28 = vpop.xlane.xlu0 %1973 }
 0x6ae   : > { %v1978_v32 = vmul.f32 0.03125, %v1974_v28 }
 0x6af   : > { %v1977_v4 = vpop.xlane.xlu1 %1976 }
 0x6b0   : > { %v1980_v5 = vsub.f32 %v3311_v62, %v1978_v32  ;;  %v1979_v26 = vmul.f32 0.03125, %v1977_v4 }
 0x6b2   : > { %v1981_v0 = vsub.f32 %v3314_v2, %v1979_v26  ;;  %v1982_v29 = vmul.f32 %v1980_v5, %v1980_v5 }
 0x6b4   : > { %v1984_v1 = vsel %vm447_vm0, %v1982_v29, 0.0  ;;  %v1983_v33 = vmul.f32 %v1981_v0, %v1981_v0 }
 0x6b5   : > { %1985 = vadd.xlane.f32.xlu0 %v1984_v1 }
 0x6b6   : > { %v1987_v6 = vsel %vm447_vm0, %v1983_v33, 0.0 }
 0x6b7   : > { %1988 = vadd.xlane.f32.xlu1 %v1987_v6 }
 0x742   : > { %v1986_v9 = vpop.xlane.xlu0 %1985 }
 0x743   : > { %v1990_v10 = vmul.f32 0.03125, %v1986_v9 }
 0x744   : > { %v1989_v11 = vpop.xlane.xlu1 %1988 }
 0x745   : > { %v1992_v12 = vadd.f32 1e-06, %v1990_v10  ;;  %v1991_v13 = vmul.f32 0.03125, %v1989_v11 }
 0x747   : > { %2776 = vrsqrt.f32 %v1992_v12  ;;  %v1993_v14 = vadd.f32 1e-06, %v1991_v13 }
 0x749   : > { %2778 = vrsqrt.f32 %v1993_v14 }
 0x751   : > { %v2777_v15 = vpop.eup %2776 }
 0x752   : > { %v1996_v18 = vmul.f32 %v2777_v15, %v1980_v5 }
 0x753   : > { %v2779_v23 = vpop.eup %2778 }
 0x754   : > { %v2004_v24 = vmul.f32 %v2393_v17, %v1996_v18  ;;  %v1997_v27 = vmul.f32 %v2779_v23, %v1981_v0 }
 0x756   : > { %v2005_v21 = vmul.f32 %v2393_v17, %v1997_v27  ;;  %v2012_v20 = vadd.f32 %v2394_v19, %v2004_v24 }
 0x758   : > { %v2013_v22 = vadd.f32 %v2394_v19, %v2005_v21 }
 0x75a   : > { %v2014_v30 = vpack.c.bf16 %v2013_v22, %v2012_v20 }
 0x75c   : > { %2652 = vmatmul.mubr.msk.bf16.vlgmr.msra.gmra.mrb[48].mxu0 %vm447_vm0, %v2014_v30 }
 0x82f   : > { %v2075_v38 = vpop.f32.mrb[48].mxu0 }
 0x830   : > { %v2076_v39 = vadd.f32 %v2395_v37, %v2075_v38  ;;  %v2653_v40 = vpop.f32.mrb[49].mxu0 }
 0x831   : > { %v2078_v41 = vpop.f32.mrb[50].mxu0 }
 0x832   : > { %v2084_v42 = vmul.f32 0.044715, %v2076_v39  ;;  %v2079_v43 = vadd.f32 %v2395_v37, %v2078_v41  ;;  %v2654_v44 = vpop.f32.mrb[51].mxu0  ;;  %v2082_v56 = vmul.f32 0.5, %v2076_v39 }
 0x834   : > { %v2086_v45 = vmul.f32 %v2084_v42, %v2076_v39  ;;  %v2085_v46 = vmul.f32 0.044715, %v2079_v43  ;;  %v2083_v57 = vmul.f32 0.5, %v2079_v43 }
 0x836   : > { %v2088_v47 = vmul.f32 %v2086_v45, %v2076_v39  ;;  %v2087_v48 = vmul.f32 %v2085_v46, %v2079_v43 }
 0x838   : > { %v2090_v49 = vadd.f32 %v2088_v47, %v2076_v39  ;;  %v2089_v50 = vmul.f32 %v2087_v48, %v2079_v43 }
 0x83a   : > { %v2092_v51 = vmul.f32 0.7978846, %v2090_v49  ;;  %v2091_v16 = vadd.f32 %v2089_v50, %v2079_v43 }
 0x83c   : > { %2780 = vtanh.f32 %v2092_v51  ;;  %v2093_v52 = vmul.f32 0.7978846, %v2091_v16 }
 0x83e   : > { %2782 = vtanh.f32 %v2093_v52 }
 0x846   : > { %v2781_v53 = vpop.eup %2780 }
 0x847   : > { %v2096_v54 = vadd.f32 1.0, %v2781_v53 }
 0x848   : > { %v2783_v55 = vpop.eup %2782 }
 0x849   : > { %v2097_v58 = vadd.f32 1.0, %v2783_v55  ;;  %v2098_v59 = vmul.f32 %v2096_v54, %v2082_v56 }
 0x84b   : > { %v2099_v60 = vmul.f32 %v2097_v58, %v2083_v57 }
 0x84d   : > { %v2100_v61 = vpack.c.bf16 %v2099_v60, %v2098_v59 }
 0x84f   : > { %2664 = vmatmul.mubr.msk.bf16.vlgmr.msra.gmra.mrb[48].mxu1 %vm2140_vm5, %v2100_v61 }
 0x922   : > { %v2178_v3 = vpop.f32.mrb[48].mxu1 }
 0x923   : > { %v2179_v25 = vadd.f32 %v2399_v63, %v2178_v3  ;;  %v2665_v28 = vpop.f32.mrb[49].mxu1 }
 0x924   : > { %v2181_v32 = vpop.f32.mrb[50].mxu1 }
 0x925   : > { %v2185_v4 = vadd.f32 %v2179_v25, %v3311_v62  ;;  %v2182_v5 = vadd.f32 %v2399_v63, %v2181_v32  ;;  %v2666_v26 = vpop.f32.mrb[51].mxu1 }
 0x927   : > { %2187 = vst.msk [vmem:[%s434_s21] sm:$0xff] %vm447_vm0, %v2185_v4  ;;  %v2186_v0 = vadd.f32 %v2182_v5, %v3314_v2 }
 0x929   : > { %2188 = vst.msk [vmem:[%s434_s21 + $0x8] sm:$0xff] %vm447_vm0, %v2186_v0 }
 0x92a   : > { %2797 = shalt.err (!%p2794_p3)
}
 0x92b   : > { %s2798_s30 = scalar_lea.hbm %s3365_s1, 256  ;;  %s2802_s24 = scalar_lea.hbm %s3426_s13, 512 }
 0x92c   : > { %p2799_p4 = scmp.ne.s32.totalorder %s3365_s1, %s2798_s30  ;;  %p2803_p9 = scmp.lt.u32.totalorder %s3365_s1, %s3426_s13 }
 0x92d   : > { %p2804_p10 = scmp.lt.u32.totalorder %s2802_s24, %s2798_s30  ;;  %p2806_p12 = scmp.lt.u32.totalorder %s2798_s30, %s3365_s1 }
 0x92e   : > { %p2800_p7 = pnand %p2799_p4, %p2961_p5 }
 0x92f   : > { %p2805_p11 = por %p2804_p10, %p2803_p9 }
 0x930   : > { %p2801_p8 = pneg %p2800_p7 }
 0x931   : > { %p2807_p13 = por %p2806_p12, %p2805_p11 }
 0x933   : > { %p2808_p0 = pnand %p2807_p13, %p2801_p8 }
 0x935   : > { %2811 = shalt.err (!%p2808_p0)
}
 0x936   : > { %s2851_s15 = smov 128   ;;  %s2852_s20 = smov 8  }
 0x937   : > { %2667 = dma.vmem_to_hbm [thread:$0]  (%p2961_p5), %s3367_s22, 256, %s3365_s1, %s3372_s29, %s2851_s15, %s2851_s15, %s2852_s20  }
 0x938 PF: > { %p2673_p1 = scmp.ge.s32.totalorder %s2846_s28, 2  ;;  %s2218_s21 = sand.u32 1, %s2834_s25  }
 0x939   : > { %s2219_s30 = scalar_lea.sflag [#allocation3], %s2218_s21 }
 0x93a   : > { %p2670_p2 = pnand %p2673_p1, %p2965_p6 }
 0x93c   : > { %2829 = dma.done.wait (!%p2670_p2), %s2219_s30, 256  }
 0x93d   : > { %2831 = vsyncadd (!%p2670_p2), %s2219_s30, 4294967040  ;;  %p23_p3 = scmp.ge.s32.totalorder %s2948_s14, 4   ;;  %s3433_s25 = smov %s2838_s26 }
 0x93e   : > { %s3434_s26 = smov %s2842_s27  ;;  %s3435_s27 = smov %s2959_s17 }
 0x93f   : > { %s3436_s28 = smov %s2948_s14  ;;  %25 = sbr.rel (!%p23_p3) target bundleno = 6 (0x6), region = 132 }
 0x946   :  { %2224 = vsyncpa [#allocation3], 1 }
 0x947   :  { %2226 = vsyncpa [#allocation3 + $0x1], 1 }

</bundles_post_ra>
